<compile_context>
chip_gen: v5e
topology: v5e:2x2
jax: 0.10.0
libtpu: 0.0.40
codegen_flags: <defaults>
</compile_context>

<pallas_src>
import jax
import jax.numpy as jnp
from jax.experimental import pallas as pl
from jax.experimental.pallas import tpu as pltpu

# ----------------------------- model sizes ---------------------------------
NODE_FEAT_DIM = 16
EDGE_FEAT_DIM = 16
EDGE_OUT_DIM = 32
NODE_OUT_DIM = 32
EXTRA_DIM = 16
NUM_ROUNDS1 = 2
NUM_ROUNDS2 = 2
NUM_EXPERTS = 4
MOE_HID_DIM = 32
MOE_IN_DIM = 2 * NODE_OUT_DIM + EXTRA_DIM     # 80
MOE_WIDE = NUM_EXPERTS * MOE_HID_DIM          # 128 = one full vreg lane width
OUT_LANES = 128                               # lane-dense output slab
WSLAB_LANES = 128                             # weight slab lane width
ALIGN = 16                                    # row alignment (bf16 sublane tile)


def _rup(x, m):
    return -(-x // m) * m


def _dot(a, b):
    return jnp.dot(a, b, preferred_element_type=jnp.float32)


# ------------------------------ fused kernel --------------------------------
def _make_kernel(w_off, cfg_u, cfg_v, num_rounds1, num_rounds2, batch):
    """Build the fused kernel; all offsets / sizes are static Python ints."""
    relu = lambda x: jnp.maximum(x, 0.0)

    def kernel(struct_u, feat_u, struct_v, feat_v, extra, w_ref, o_ref):
        def w(name):
            r0, nr, nc = w_off[name]
            return w_ref[r0:r0 + nr, 0:nc]

        def branch(s_ref, f_ref, cfg, tag, num_rounds):
            n_pad, e_pad, eh_pad = cfg['N_pad'], cfg['E_pad'], cfg['Eh_pad']
            # structure slab (bf16): [src_oh ; A_dst ; S]
            src_oh = s_ref[0:e_pad, 0:n_pad]                             # (E, N)
            a_dst = s_ref[e_pad:e_pad + n_pad, 0:e_pad]                  # (N, E)
            seg = s_ref[e_pad + n_pad:e_pad + n_pad + batch, 0:n_pad]    # (B, N)
            # feature slab (f32): [node_feat ; edge_feat]
            nf = f_ref[0:n_pad, 0:NODE_FEAT_DIM]                         # (N, Fn)
            ef = f_ref[n_pad:n_pad + e_pad, 0:EDGE_FEAT_DIM]             # (E, Fe)

            # h0 = relu(concat([node_feat[src], edge_feat]) @ W)   (bias=False)
            # split-K form; the gather is a bf16 one-hot matmul (exact selection)
            gathered = _dot(src_oh, nf.astype(jnp.bfloat16))             # (E, Fn)
            h0 = relu(_dot(gathered, w('wn_' + tag))
                      + _dot(ef, w('we_' + tag)))                        # (E, D)

            wupd = w('wupd_' + tag)

            # D-MPNN rounds, factorized message:
            #   sum0       = A_dst @ h                (per-node incoming sum)
            #   sum0[src]  = src_oh @ sum0            (scatter back to edges)
            #   h[rev]     = roll(h, E/2) over sublanes (forward/reverse halves)
            def round_body(_, h):
                node_sum = _dot(a_dst, h.astype(jnp.bfloat16))           # (N, D)
                sum_e = _dot(src_oh, node_sum.astype(jnp.bfloat16))      # (E, D)
                h_rev = pltpu.roll(h, shift=eh_pad, axis=0)              # (E, D)
                msg = sum_e - h_rev
                return relu(_dot(msg, wupd) + h0)

            h = jax.lax.fori_loop(0, num_rounds, round_body, h0, unroll=True)

            # node update: m[n] = sum_{dst(e)=n} h[e];  h_n = relu([feat|m]@W+b)
            m_node = _dot(a_dst, h.astype(jnp.bfloat16))                 # (N, D)
            h_node = relu(_dot(nf, w('wf_' + tag)) + _dot(m_node, w('wm_' + tag))
                          + w('bnode_' + tag))                           # (N, Dn)
            # readout: per-graph sum over nodes (padded nodes have zero S cols)
            return _dot(seg, h_node.astype(jnp.bfloat16))                # (B, Dn)

        solute = branch(struct_u, feat_u, cfg_u, 'u', num_rounds1)
        solvent = branch(struct_v, feat_v, cfg_v, 'v', num_rounds2)
        xtr = extra[...]
        # combined = concat([solute, solvent, extra]) realized as split-K dots.

        # gating MLP + softmax over experts
        g = relu(_dot(solute, w('gw1a')) + _dot(solvent, w('gw1b'))
                 + _dot(xtr, w('gw1c')) + w('gb1'))
        g = relu(_dot(g, w('gw2')) + w('gb2'))
        logits = _dot(g, w('gw3')) + w('gb3')                            # (B, Ne)
        logits = logits - jnp.max(logits, axis=1, keepdims=True)
        e = jnp.exp(logits)
        gate = e * pl.reciprocal(jnp.sum(e, axis=1, keepdims=True), approx=True)

        # all 4 experts batched into one lane-dense 128-wide MLP
        h1 = relu(_dot(solute, w('ew1a')) + _dot(solvent, w('ew1b'))
                  + _dot(xtr, w('ew1c')) + w('eb1'))                     # (B, 128)
        h2 = relu(_dot(h1, w('ew2bd')) + w('eb2'))                       # (B, 128)
        expert_out = _dot(h2, w('ew3c')) + w('eb3')                      # (B, Ne)

        final = jnp.sum(expert_out * gate, axis=1, keepdims=True)        # (B, 1)
        # lane-dense (unmasked) store; wrapper slices back to (B, 1)
        o_ref[...] = jnp.broadcast_to(final, o_ref.shape)

    return kernel


# ------------------------------ graph glue -----------------------------------
def make_ring_batch(key, sizes, node_feat_dim, edge_feat_dim):
    """Batch of undirected ring graphs as directed edge pairs.

    Edge ordering: all 'forward' directed edges in [0, Eh_pad), their reverses
    in [Eh_pad, 2*Eh_pad) at the same offset, so rev(e) = (e + Eh_pad) % E_pad
    and the in-kernel reverse gather is a single sublane roll (no E x E matrix).
    Structure is dense one-hot bf16 (exact) so gathers/scatter-adds are MXU
    matmuls; padded rows/cols are all-zero.
    """
    fwd_src, fwd_dst, gid = [], [], []
    off = 0
    for g, n in enumerate(sizes):
        for i in range(n):
            fwd_src.append(off + i)
            fwd_dst.append(off + (i + 1) % n)
        gid += [g] * n
        off += n
    n_nodes, eh = off, len(fwd_src)
    n_pad = _rup(n_nodes, ALIGN)
    eh_pad = _rup(eh, ALIGN)
    e_pad = 2 * eh_pad
    num_graphs = len(sizes)

    pad = [-1] * (eh_pad - eh)
    src = jnp.array(fwd_src + pad + fwd_dst + pad, jnp.int32)   # reverse: swap src/dst
    dst = jnp.array(fwd_dst + pad + fwd_src + pad, jnp.int32)
    gid = jnp.array(gid + [-1] * (n_pad - n_nodes), jnp.int32)

    k1, k2 = jax.random.split(key)
    node_feat = jnp.zeros((n_pad, node_feat_dim), jnp.float32).at[:n_nodes].set(
        jax.random.normal(k1, (n_nodes, node_feat_dim), dtype=jnp.float32))
    ef_raw = jax.random.normal(k2, (2 * eh, edge_feat_dim), dtype=jnp.float32)
    edge_feat = jnp.zeros((e_pad, edge_feat_dim), jnp.float32)
    edge_feat = edge_feat.at[:eh].set(ef_raw[:eh])
    edge_feat = edge_feat.at[eh_pad:eh_pad + eh].set(ef_raw[eh:])

    src_oh = jax.nn.one_hot(src, n_pad, dtype=jnp.bfloat16)     # (E, N), pad -> 0
    a_dst = jax.nn.one_hot(dst, n_pad, dtype=jnp.bfloat16).T    # (N, E)
    seg = jax.nn.one_hot(gid, num_graphs, dtype=jnp.bfloat16).T  # (B, N)

    # One bf16 structure slab + one f32 feature slab per graph (few big DMAs).
    b_rows = _rup(num_graphs, ALIGN)
    width = max(n_pad, e_pad)
    struct = jnp.zeros((e_pad + n_pad + b_rows, width), jnp.bfloat16)
    struct = struct.at[:e_pad, :n_pad].set(src_oh)
    struct = struct.at[e_pad:e_pad + n_pad, :e_pad].set(a_dst)
    struct = struct.at[e_pad + n_pad:e_pad + n_pad + num_graphs, :n_pad].set(seg)

    fwidth = max(node_feat_dim, edge_feat_dim)
    feat = jnp.zeros((n_pad + e_pad, fwidth), jnp.float32)
    feat = feat.at[:n_pad, :node_feat_dim].set(node_feat)
    feat = feat.at[n_pad:n_pad + e_pad, :edge_feat_dim].set(edge_feat)

    return dict(struct=struct, feat=feat,
                N_pad=n_pad, E_pad=e_pad, Eh_pad=eh_pad, num_graphs=num_graphs)


# ------------------------------ parameters -----------------------------------
def init_params(key):
    def dense(k, shape, scale=0.1):
        return scale * jax.random.normal(k, shape, dtype=jnp.float32)

    keys = jax.random.split(key, 32)
    p = {}
    # edge_mlp (bias=False): weight split over [node_feat | edge_feat]
    p['edge_wn_u'] = dense(keys[0], (NODE_FEAT_DIM, EDGE_OUT_DIM))
    p['edge_we_u'] = dense(keys[1], (EDGE_FEAT_DIM, EDGE_OUT_DIM))
    p['edge_wn_v'] = dense(keys[2], (NODE_FEAT_DIM, EDGE_OUT_DIM))
    p['edge_we_v'] = dense(keys[3], (EDGE_FEAT_DIM, EDGE_OUT_DIM))
    # edge_update_mlp (bias=False)
    p['upd_w_u'] = dense(keys[4], (EDGE_OUT_DIM, EDGE_OUT_DIM))
    p['upd_w_v'] = dense(keys[5], (EDGE_OUT_DIM, EDGE_OUT_DIM))
    # node_mlp (bias=True): weight split over [node_feat | aggregated edge feat]
    p['node_wf_u'] = dense(keys[6], (NODE_FEAT_DIM, NODE_OUT_DIM))
    p['node_wm_u'] = dense(keys[7], (EDGE_OUT_DIM, NODE_OUT_DIM))
    p['node_b_u'] = dense(keys[8], (1, NODE_OUT_DIM))
    p['node_wf_v'] = dense(keys[9], (NODE_FEAT_DIM, NODE_OUT_DIM))
    p['node_wm_v'] = dense(keys[10], (EDGE_OUT_DIM, NODE_OUT_DIM))
    p['node_b_v'] = dense(keys[11], (1, NODE_OUT_DIM))
    # MoE experts (stacked over expert axis)
    p['ew1'] = dense(keys[12], (NUM_EXPERTS, MOE_IN_DIM, MOE_HID_DIM))
    p['eb1'] = dense(keys[13], (NUM_EXPERTS, 1, MOE_HID_DIM))
    p['ew2'] = dense(keys[14], (NUM_EXPERTS, MOE_HID_DIM, MOE_HID_DIM))
    p['eb2'] = dense(keys[15], (NUM_EXPERTS, 1, MOE_HID_DIM))
    p['ew3'] = dense(keys[16], (NUM_EXPERTS, MOE_HID_DIM, 1))
    p['eb3'] = dense(keys[17], (NUM_EXPERTS, 1, 1))
    # MoE gating
    p['gw1'] = dense(keys[18], (MOE_IN_DIM, MOE_HID_DIM))
    p['gb1'] = dense(keys[19], (1, MOE_HID_DIM))
    p['gw2'] = dense(keys[20], (MOE_HID_DIM, MOE_HID_DIM))
    p['gb2'] = dense(keys[21], (1, MOE_HID_DIM))
    p['gw3'] = dense(keys[22], (MOE_HID_DIM, NUM_EXPERTS))
    p['gb3'] = dense(keys[23], (1, NUM_EXPERTS))
    return p


def prepare_fused_params(p):
    """Re-layout raw params to kernel-ready lane-dense pieces, then pack ALL 28
    weight/bias tensors into ONE (R,128) f32 slab (1 DMA instead of 28).
    Returns (slab, offsets) with offsets[name] = (row0, nrows, ncols)."""
    pieces = []

    def add(name, a):
        pieces.append((name, jnp.asarray(a, jnp.float32)))

    # branch weights kept as split-K pieces (== merged wide-K matmul algebraically)
    for s in ('u', 'v'):
        add('wn_' + s, p['edge_wn_' + s])
        add('we_' + s, p['edge_we_' + s])
        add('wupd_' + s, p['upd_w_' + s])
        add('wf_' + s, p['node_wf_' + s])
        add('wm_' + s, p['node_wm_' + s])
        add('bnode_' + s, p['node_b_' + s])
    # experts batched: layer1 -> (80, 128), split over [solute|solvent|extra]
    ew1 = jnp.concatenate([p['ew1'][e] for e in range(NUM_EXPERTS)], axis=1)
    add('ew1a', ew1[:NODE_OUT_DIM])
    add('ew1b', ew1[NODE_OUT_DIM:2 * NODE_OUT_DIM])
    add('ew1c', ew1[2 * NODE_OUT_DIM:])
    add('eb1', jnp.concatenate([p['eb1'][e] for e in range(NUM_EXPERTS)], axis=1))
    # layer2 -> block-diagonal (128,128) so each expert only sees its own block
    add('ew2bd', jax.scipy.linalg.block_diag(
        *[p['ew2'][e] for e in range(NUM_EXPERTS)]))
    add('eb2', jnp.concatenate([p['eb2'][e] for e in range(NUM_EXPERTS)], axis=1))
    # layer3 -> (128, NUM_EXPERTS) with expert e's weights in column e
    ew3 = jnp.zeros((MOE_WIDE, NUM_EXPERTS), jnp.float32)
    for e in range(NUM_EXPERTS):
        ew3 = ew3.at[e * MOE_HID_DIM:(e + 1) * MOE_HID_DIM, e].set(
            p['ew3'][e][:, 0])
    add('ew3c', ew3)
    add('eb3', jnp.concatenate([p['eb3'][e] for e in range(NUM_EXPERTS)], axis=1))
    # gating; first layer split over [solute|solvent|extra]
    add('gw1a', p['gw1'][:NODE_OUT_DIM])
    add('gw1b', p['gw1'][NODE_OUT_DIM:2 * NODE_OUT_DIM])
    add('gw1c', p['gw1'][2 * NODE_OUT_DIM:])
    add('gb1', p['gb1'])
    add('gw2', p['gw2'])
    add('gb2', p['gb2'])
    add('gw3', p['gw3'])
    add('gb3', p['gb3'])

    offsets, row = {}, 0
    for name, a in pieces:
        offsets[name] = (row, a.shape[0], a.shape[1])
        row += _rup(a.shape[0], 8)          # keep every piece sublane-aligned
    slab = jnp.zeros((_rup(row, 8), WSLAB_LANES), jnp.float32)
    for name, a in pieces:
        r0, nr, nc = offsets[name]
        slab = slab.at[r0:r0 + nr, :nc].set(a)
    return slab, offsets


# ------------------------------- forward -------------------------------------
def dmpnn_forward(w_slab, w_off, solute_graph, solvent_graph, extra_features):
    """Whole forward pass = ONE pallas_call (everything resident in VMEM)."""
    B = extra_features.shape[0]
    cfg_u = {k: solute_graph[k] for k in ('N_pad', 'E_pad', 'Eh_pad')}
    cfg_v = {k: solvent_graph[k] for k in ('N_pad', 'E_pad', 'Eh_pad')}
    kernel = _make_kernel(w_off, cfg_u, cfg_v, NUM_ROUNDS1, NUM_ROUNDS2, B)

    inputs = (solute_graph['struct'], solute_graph['feat'],
              solvent_graph['struct'], solvent_graph['feat'],
              extra_features, w_slab)

    # Explicit VMEM budget (default scoped limit is only 16/32 MiB) and an
    # advisory cost estimate; cap the budget at v7x-safe 64 MiB.
    in_bytes = sum(int(x.size) * x.dtype.itemsize for x in inputs)
    out_bytes = B * OUT_LANES * 4
    vmem_limit = int(min(max(4 * (in_bytes + out_bytes) + (8 << 20), 16 << 20),
                         64 << 20))

    def _branch_flops(cfg, rounds):
        n, e, d = cfg['N_pad'], cfg['E_pad'], EDGE_OUT_DIM
        init = 2 * e * n * NODE_FEAT_DIM + 2 * e * (NODE_FEAT_DIM + EDGE_FEAT_DIM) * d
        per_round = 4 * n * e * d + 2 * e * d * d
        node = 2 * n * e * d + 2 * n * (NODE_FEAT_DIM + d) * NODE_OUT_DIM \
            + 2 * B * n * NODE_OUT_DIM
        return init + rounds * per_round + node

    flops = (_branch_flops(cfg_u, NUM_ROUNDS1) + _branch_flops(cfg_v, NUM_ROUNDS2)
             + 2 * B * (MOE_IN_DIM * (MOE_WIDE + MOE_HID_DIM) + MOE_WIDE * MOE_WIDE
                        + MOE_HID_DIM * MOE_HID_DIM + MOE_WIDE * NUM_EXPERTS
                        + MOE_HID_DIM * NUM_EXPERTS))

    vmem_spec = pl.BlockSpec(memory_space=pltpu.MemorySpace.VMEM)
    out = pl.pallas_call(
        kernel,
        out_shape=jax.ShapeDtypeStruct((B, OUT_LANES), jnp.float32),
        in_specs=[vmem_spec] * len(inputs),
        out_specs=vmem_spec,
        compiler_params=pltpu.CompilerParams(vmem_limit_bytes=vmem_limit),
        cost_estimate=pl.CostEstimate(flops=int(flops),
                                      transcendentals=int(2 * B * NUM_EXPERTS),
                                      bytes_accessed=int(in_bytes + out_bytes)),
    )(*inputs)
    return out[:, :1]


# --------------------------------- main ---------------------------------------
if __name__ == "__main__":
    key = jax.random.PRNGKey(0)
    k_params, k_solute, k_solvent, k_extra = jax.random.split(key, 4)

    params = init_params(k_params)
    w_slab, w_off = prepare_fused_params(params)
    solute_graph = make_ring_batch(k_solute, sizes=[5, 6],
                                   node_feat_dim=NODE_FEAT_DIM,
                                   edge_feat_dim=EDGE_FEAT_DIM)
    solvent_graph = make_ring_batch(k_solvent, sizes=[4, 7],
                                    node_feat_dim=NODE_FEAT_DIM,
                                    edge_feat_dim=EDGE_FEAT_DIM)
    extra_features = jax.random.normal(k_extra, (2, EXTRA_DIM), dtype=jnp.float32)

    out = dmpnn_forward(w_slab, w_off, solute_graph, solvent_graph, extra_features)
    out = jax.block_until_ready(out)
    assert out.shape == (2, 1)
    assert bool(jnp.all(jnp.isfinite(out)))
    print("KERNEL_OK")
</pallas_src>

<mosaic_0001>
module attributes {stable_mosaic.version = 11 : i64} {
  func.func @kernel(%arg0: memref<64x32xbf16, #tpu.memory_space<vmem>>, %arg1: memref<48x16xf32, #tpu.memory_space<vmem>>, %arg2: memref<64x32xbf16, #tpu.memory_space<vmem>>, %arg3: memref<48x16xf32, #tpu.memory_space<vmem>>, %arg4: memref<2x16xf32, #tpu.memory_space<vmem>>, %arg5: memref<768x128xf32, #tpu.memory_space<vmem>>, %arg6: memref<2x128xf32, #tpu.memory_space<vmem>>) attributes {dimension_semantics = [], scalar_prefetch = 0 : i64, scratch_operands = 0 : i64, tpu.core_type = #tpu.core_type<tc>} {
    %c0 = arith.constant 0 : index
    %c0_0 = arith.constant 0 : index
    %0 = vector.load %arg0[%c0, %c0_0] : memref<64x32xbf16, #tpu.memory_space<vmem>>, vector<32x16xbf16>
    %c32 = arith.constant 32 : index
    %c0_1 = arith.constant 0 : index
    %1 = vector.load %arg0[%c32, %c0_1] : memref<64x32xbf16, #tpu.memory_space<vmem>>, vector<16x32xbf16>
    %c48 = arith.constant 48 : index
    %c0_2 = arith.constant 0 : index
    %2 = vector.load %arg0[%c48, %c0_2] : memref<64x32xbf16, #tpu.memory_space<vmem>>, vector<2x16xbf16>
    %c0_3 = arith.constant 0 : index
    %c0_4 = arith.constant 0 : index
    %3 = vector.load %arg1[%c0_3, %c0_4] : memref<48x16xf32, #tpu.memory_space<vmem>>, vector<16x16xf32>
    %c16 = arith.constant 16 : index
    %c0_5 = arith.constant 0 : index
    %4 = vector.load %arg1[%c16, %c0_5] : memref<48x16xf32, #tpu.memory_space<vmem>>, vector<32x16xf32>
    %5 = arith.truncf %3 : vector<16x16xf32> to vector<16x16xbf16>
    %cst = arith.constant dense<0.000000e+00> : vector<32x16xf32>
    %6 = tpu.matmul %0, %5, %cst {dimension_numbers = #tpu.dot_dimension_numbers<[1], [0], [0], [1], [0, 0, 1, 1], [], []>} : vector<32x16xbf16>, vector<16x16xbf16>, vector<32x16xf32> -> vector<32x16xf32>
    %c0_6 = arith.constant 0 : index
    %c0_7 = arith.constant 0 : index
    %7 = vector.load %arg5[%c0_6, %c0_7] : memref<768x128xf32, #tpu.memory_space<vmem>>, vector<16x32xf32>
    %cst_8 = arith.constant dense<0.000000e+00> : vector<32x32xf32>
    %8 = tpu.matmul %6, %7, %cst_8 {dimension_numbers = #tpu.dot_dimension_numbers<[1], [0], [0], [1], [0, 0, 1, 1], [], []>} : vector<32x16xf32>, vector<16x32xf32>, vector<32x32xf32> -> vector<32x32xf32>
    %c16_9 = arith.constant 16 : index
    %c0_10 = arith.constant 0 : index
    %9 = vector.load %arg5[%c16_9, %c0_10] : memref<768x128xf32, #tpu.memory_space<vmem>>, vector<16x32xf32>
    %cst_11 = arith.constant dense<0.000000e+00> : vector<32x32xf32>
    %10 = tpu.matmul %4, %9, %cst_11 {dimension_numbers = #tpu.dot_dimension_numbers<[1], [0], [0], [1], [0, 0, 1, 1], [], []>} : vector<32x16xf32>, vector<16x32xf32>, vector<32x32xf32> -> vector<32x32xf32>
    %11 = arith.addf %8, %10 : vector<32x32xf32>
    %cst_12 = arith.constant 0.000000e+00 : f32
    %12 = vector.broadcast %cst_12 : f32 to vector<32x32xf32>
    %13 = arith.maximumf %11, %12 : vector<32x32xf32>
    %c32_13 = arith.constant 32 : index
    %c0_14 = arith.constant 0 : index
    %14 = vector.load %arg5[%c32_13, %c0_14] : memref<768x128xf32, #tpu.memory_space<vmem>>, vector<32x32xf32>
    %c0_i32 = arith.constant 0 : i32
    %15 = arith.truncf %13 : vector<32x32xf32> to vector<32x32xbf16>
    %cst_15 = arith.constant dense<0.000000e+00> : vector<16x32xf32>
    %16 = tpu.matmul %1, %15, %cst_15 {dimension_numbers = #tpu.dot_dimension_numbers<[1], [0], [0], [1], [0, 0, 1, 1], [], []>} : vector<16x32xbf16>, vector<32x32xbf16>, vector<16x32xf32> -> vector<16x32xf32>
    %17 = arith.truncf %16 : vector<16x32xf32> to vector<16x32xbf16>
    %cst_16 = arith.constant dense<0.000000e+00> : vector<32x32xf32>
    %18 = tpu.matmul %0, %17, %cst_16 {dimension_numbers = #tpu.dot_dimension_numbers<[1], [0], [0], [1], [0, 0, 1, 1], [], []>} : vector<32x16xbf16>, vector<16x32xbf16>, vector<32x32xf32> -> vector<32x32xf32>
    %c16_i32 = arith.constant 16 : i32
    %19 = tpu.dynamic_rotate %13 by %c16_i32 dim 0 : vector<32x32xf32>, i32 -> vector<32x32xf32>
    %20 = arith.subf %18, %19 : vector<32x32xf32>
    %cst_17 = arith.constant dense<0.000000e+00> : vector<32x32xf32>
    %21 = tpu.matmul %20, %14, %cst_17 {dimension_numbers = #tpu.dot_dimension_numbers<[1], [0], [0], [1], [0, 0, 1, 1], [], []>} : vector<32x32xf32>, vector<32x32xf32>, vector<32x32xf32> -> vector<32x32xf32>
    %22 = arith.addf %21, %13 : vector<32x32xf32>
    %cst_18 = arith.constant 0.000000e+00 : f32
    %23 = vector.broadcast %cst_18 : f32 to vector<32x32xf32>
    %24 = arith.maximumf %22, %23 : vector<32x32xf32>
    %c1_i32 = arith.constant 1 : i32
    %25 = arith.truncf %24 : vector<32x32xf32> to vector<32x32xbf16>
    %cst_19 = arith.constant dense<0.000000e+00> : vector<16x32xf32>
    %26 = tpu.matmul %1, %25, %cst_19 {dimension_numbers = #tpu.dot_dimension_numbers<[1], [0], [0], [1], [0, 0, 1, 1], [], []>} : vector<16x32xbf16>, vector<32x32xbf16>, vector<16x32xf32> -> vector<16x32xf32>
    %27 = arith.truncf %26 : vector<16x32xf32> to vector<16x32xbf16>
    %cst_20 = arith.constant dense<0.000000e+00> : vector<32x32xf32>
    %28 = tpu.matmul %0, %27, %cst_20 {dimension_numbers = #tpu.dot_dimension_numbers<[1], [0], [0], [1], [0, 0, 1, 1], [], []>} : vector<32x16xbf16>, vector<16x32xbf16>, vector<32x32xf32> -> vector<32x32xf32>
    %c16_i32_21 = arith.constant 16 : i32
    %29 = tpu.dynamic_rotate %24 by %c16_i32_21 dim 0 : vector<32x32xf32>, i32 -> vector<32x32xf32>
    %30 = arith.subf %28, %29 : vector<32x32xf32>
    %cst_22 = arith.constant dense<0.000000e+00> : vector<32x32xf32>
    %31 = tpu.matmul %30, %14, %cst_22 {dimension_numbers = #tpu.dot_dimension_numbers<[1], [0], [0], [1], [0, 0, 1, 1], [], []>} : vector<32x32xf32>, vector<32x32xf32>, vector<32x32xf32> -> vector<32x32xf32>
    %32 = arith.addf %31, %13 : vector<32x32xf32>
    %cst_23 = arith.constant 0.000000e+00 : f32
    %33 = vector.broadcast %cst_23 : f32 to vector<32x32xf32>
    %34 = arith.maximumf %32, %33 : vector<32x32xf32>
    %35 = arith.truncf %34 : vector<32x32xf32> to vector<32x32xbf16>
    %cst_24 = arith.constant dense<0.000000e+00> : vector<16x32xf32>
    %36 = tpu.matmul %1, %35, %cst_24 {dimension_numbers = #tpu.dot_dimension_numbers<[1], [0], [0], [1], [0, 0, 1, 1], [], []>} : vector<16x32xbf16>, vector<32x32xbf16>, vector<16x32xf32> -> vector<16x32xf32>
    %c64 = arith.constant 64 : index
    %c0_25 = arith.constant 0 : index
    %37 = vector.load %arg5[%c64, %c0_25] : memref<768x128xf32, #tpu.memory_space<vmem>>, vector<16x32xf32>
    %cst_26 = arith.constant dense<0.000000e+00> : vector<16x32xf32>
    %38 = tpu.matmul %3, %37, %cst_26 {dimension_numbers = #tpu.dot_dimension_numbers<[1], [0], [0], [1], [0, 0, 1, 1], [], []>} : vector<16x16xf32>, vector<16x32xf32>, vector<16x32xf32> -> vector<16x32xf32>
    %c80 = arith.constant 80 : index
    %c0_27 = arith.constant 0 : index
    %39 = vector.load %arg5[%c80, %c0_27] : memref<768x128xf32, #tpu.memory_space<vmem>>, vector<32x32xf32>
    %cst_28 = arith.constant dense<0.000000e+00> : vector<16x32xf32>
    %40 = tpu.matmul %36, %39, %cst_28 {dimension_numbers = #tpu.dot_dimension_numbers<[1], [0], [0], [1], [0, 0, 1, 1], [], []>} : vector<16x32xf32>, vector<32x32xf32>, vector<16x32xf32> -> vector<16x32xf32>
    %41 = arith.addf %38, %40 : vector<16x32xf32>
    %c112 = arith.constant 112 : index
    %c0_29 = arith.constant 0 : index
    %42 = vector.load %arg5[%c112, %c0_29] : memref<768x128xf32, #tpu.memory_space<vmem>>, vector<1x32xf32>
    %43 = vector.broadcast %42 : vector<1x32xf32> to vector<16x32xf32>
    %44 = arith.addf %41, %43 : vector<16x32xf32>
    %cst_30 = arith.constant 0.000000e+00 : f32
    %45 = vector.broadcast %cst_30 : f32 to vector<16x32xf32>
    %46 = arith.maximumf %44, %45 : vector<16x32xf32>
    %47 = arith.truncf %46 : vector<16x32xf32> to vector<16x32xbf16>
    %cst_31 = arith.constant dense<0.000000e+00> : vector<2x32xf32>
    %48 = tpu.matmul %2, %47, %cst_31 {dimension_numbers = #tpu.dot_dimension_numbers<[1], [0], [0], [1], [0, 0, 1, 1], [], []>} : vector<2x16xbf16>, vector<16x32xbf16>, vector<2x32xf32> -> vector<2x32xf32>
    %c0_32 = arith.constant 0 : index
    %c0_33 = arith.constant 0 : index
    %49 = vector.load %arg2[%c0_32, %c0_33] : memref<64x32xbf16, #tpu.memory_space<vmem>>, vector<32x16xbf16>
    %c32_34 = arith.constant 32 : index
    %c0_35 = arith.constant 0 : index
    %50 = vector.load %arg2[%c32_34, %c0_35] : memref<64x32xbf16, #tpu.memory_space<vmem>>, vector<16x32xbf16>
    %c48_36 = arith.constant 48 : index
    %c0_37 = arith.constant 0 : index
    %51 = vector.load %arg2[%c48_36, %c0_37] : memref<64x32xbf16, #tpu.memory_space<vmem>>, vector<2x16xbf16>
    %c0_38 = arith.constant 0 : index
    %c0_39 = arith.constant 0 : index
    %52 = vector.load %arg3[%c0_38, %c0_39] : memref<48x16xf32, #tpu.memory_space<vmem>>, vector<16x16xf32>
    %c16_40 = arith.constant 16 : index
    %c0_41 = arith.constant 0 : index
    %53 = vector.load %arg3[%c16_40, %c0_41] : memref<48x16xf32, #tpu.memory_space<vmem>>, vector<32x16xf32>
    %54 = arith.truncf %52 : vector<16x16xf32> to vector<16x16xbf16>
    %cst_42 = arith.constant dense<0.000000e+00> : vector<32x16xf32>
    %55 = tpu.matmul %49, %54, %cst_42 {dimension_numbers = #tpu.dot_dimension_numbers<[1], [0], [0], [1], [0, 0, 1, 1], [], []>} : vector<32x16xbf16>, vector<16x16xbf16>, vector<32x16xf32> -> vector<32x16xf32>
    %c120 = arith.constant 120 : index
    %c0_43 = arith.constant 0 : index
    %56 = vector.load %arg5[%c120, %c0_43] : memref<768x128xf32, #tpu.memory_space<vmem>>, vector<16x32xf32>
    %cst_44 = arith.constant dense<0.000000e+00> : vector<32x32xf32>
    %57 = tpu.matmul %55, %56, %cst_44 {dimension_numbers = #tpu.dot_dimension_numbers<[1], [0], [0], [1], [0, 0, 1, 1], [], []>} : vector<32x16xf32>, vector<16x32xf32>, vector<32x32xf32> -> vector<32x32xf32>
    %c136 = arith.constant 136 : index
    %c0_45 = arith.constant 0 : index
    %58 = vector.load %arg5[%c136, %c0_45] : memref<768x128xf32, #tpu.memory_space<vmem>>, vector<16x32xf32>
    %cst_46 = arith.constant dense<0.000000e+00> : vector<32x32xf32>
    %59 = tpu.matmul %53, %58, %cst_46 {dimension_numbers = #tpu.dot_dimension_numbers<[1], [0], [0], [1], [0, 0, 1, 1], [], []>} : vector<32x16xf32>, vector<16x32xf32>, vector<32x32xf32> -> vector<32x32xf32>
    %60 = arith.addf %57, %59 : vector<32x32xf32>
    %cst_47 = arith.constant 0.000000e+00 : f32
    %61 = vector.broadcast %cst_47 : f32 to vector<32x32xf32>
    %62 = arith.maximumf %60, %61 : vector<32x32xf32>
    %c152 = arith.constant 152 : index
    %c0_48 = arith.constant 0 : index
    %63 = vector.load %arg5[%c152, %c0_48] : memref<768x128xf32, #tpu.memory_space<vmem>>, vector<32x32xf32>
    %c0_i32_49 = arith.constant 0 : i32
    %64 = arith.truncf %62 : vector<32x32xf32> to vector<32x32xbf16>
    %cst_50 = arith.constant dense<0.000000e+00> : vector<16x32xf32>
    %65 = tpu.matmul %50, %64, %cst_50 {dimension_numbers = #tpu.dot_dimension_numbers<[1], [0], [0], [1], [0, 0, 1, 1], [], []>} : vector<16x32xbf16>, vector<32x32xbf16>, vector<16x32xf32> -> vector<16x32xf32>
    %66 = arith.truncf %65 : vector<16x32xf32> to vector<16x32xbf16>
    %cst_51 = arith.constant dense<0.000000e+00> : vector<32x32xf32>
    %67 = tpu.matmul %49, %66, %cst_51 {dimension_numbers = #tpu.dot_dimension_numbers<[1], [0], [0], [1], [0, 0, 1, 1], [], []>} : vector<32x16xbf16>, vector<16x32xbf16>, vector<32x32xf32> -> vector<32x32xf32>
    %c16_i32_52 = arith.constant 16 : i32
    %68 = tpu.dynamic_rotate %62 by %c16_i32_52 dim 0 : vector<32x32xf32>, i32 -> vector<32x32xf32>
    %69 = arith.subf %67, %68 : vector<32x32xf32>
    %cst_53 = arith.constant dense<0.000000e+00> : vector<32x32xf32>
    %70 = tpu.matmul %69, %63, %cst_53 {dimension_numbers = #tpu.dot_dimension_numbers<[1], [0], [0], [1], [0, 0, 1, 1], [], []>} : vector<32x32xf32>, vector<32x32xf32>, vector<32x32xf32> -> vector<32x32xf32>
    %71 = arith.addf %70, %62 : vector<32x32xf32>
    %cst_54 = arith.constant 0.000000e+00 : f32
    %72 = vector.broadcast %cst_54 : f32 to vector<32x32xf32>
    %73 = arith.maximumf %71, %72 : vector<32x32xf32>
    %c1_i32_55 = arith.constant 1 : i32
    %74 = arith.truncf %73 : vector<32x32xf32> to vector<32x32xbf16>
    %cst_56 = arith.constant dense<0.000000e+00> : vector<16x32xf32>
    %75 = tpu.matmul %50, %74, %cst_56 {dimension_numbers = #tpu.dot_dimension_numbers<[1], [0], [0], [1], [0, 0, 1, 1], [], []>} : vector<16x32xbf16>, vector<32x32xbf16>, vector<16x32xf32> -> vector<16x32xf32>
    %76 = arith.truncf %75 : vector<16x32xf32> to vector<16x32xbf16>
    %cst_57 = arith.constant dense<0.000000e+00> : vector<32x32xf32>
    %77 = tpu.matmul %49, %76, %cst_57 {dimension_numbers = #tpu.dot_dimension_numbers<[1], [0], [0], [1], [0, 0, 1, 1], [], []>} : vector<32x16xbf16>, vector<16x32xbf16>, vector<32x32xf32> -> vector<32x32xf32>
    %c16_i32_58 = arith.constant 16 : i32
    %78 = tpu.dynamic_rotate %73 by %c16_i32_58 dim 0 : vector<32x32xf32>, i32 -> vector<32x32xf32>
    %79 = arith.subf %77, %78 : vector<32x32xf32>
    %cst_59 = arith.constant dense<0.000000e+00> : vector<32x32xf32>
    %80 = tpu.matmul %79, %63, %cst_59 {dimension_numbers = #tpu.dot_dimension_numbers<[1], [0], [0], [1], [0, 0, 1, 1], [], []>} : vector<32x32xf32>, vector<32x32xf32>, vector<32x32xf32> -> vector<32x32xf32>
    %81 = arith.addf %80, %62 : vector<32x32xf32>
    %cst_60 = arith.constant 0.000000e+00 : f32
    %82 = vector.broadcast %cst_60 : f32 to vector<32x32xf32>
    %83 = arith.maximumf %81, %82 : vector<32x32xf32>
    %84 = arith.truncf %83 : vector<32x32xf32> to vector<32x32xbf16>
    %cst_61 = arith.constant dense<0.000000e+00> : vector<16x32xf32>
    %85 = tpu.matmul %50, %84, %cst_61 {dimension_numbers = #tpu.dot_dimension_numbers<[1], [0], [0], [1], [0, 0, 1, 1], [], []>} : vector<16x32xbf16>, vector<32x32xbf16>, vector<16x32xf32> -> vector<16x32xf32>
    %c184 = arith.constant 184 : index
    %c0_62 = arith.constant 0 : index
    %86 = vector.load %arg5[%c184, %c0_62] : memref<768x128xf32, #tpu.memory_space<vmem>>, vector<16x32xf32>
    %cst_63 = arith.constant dense<0.000000e+00> : vector<16x32xf32>
    %87 = tpu.matmul %52, %86, %cst_63 {dimension_numbers = #tpu.dot_dimension_numbers<[1], [0], [0], [1], [0, 0, 1, 1], [], []>} : vector<16x16xf32>, vector<16x32xf32>, vector<16x32xf32> -> vector<16x32xf32>
    %c200 = arith.constant 200 : index
    %c0_64 = arith.constant 0 : index
    %88 = vector.load %arg5[%c200, %c0_64] : memref<768x128xf32, #tpu.memory_space<vmem>>, vector<32x32xf32>
    %cst_65 = arith.constant dense<0.000000e+00> : vector<16x32xf32>
    %89 = tpu.matmul %85, %88, %cst_65 {dimension_numbers = #tpu.dot_dimension_numbers<[1], [0], [0], [1], [0, 0, 1, 1], [], []>} : vector<16x32xf32>, vector<32x32xf32>, vector<16x32xf32> -> vector<16x32xf32>
    %90 = arith.addf %87, %89 : vector<16x32xf32>
    %c232 = arith.constant 232 : index
    %c0_66 = arith.constant 0 : index
    %91 = vector.load %arg5[%c232, %c0_66] : memref<768x128xf32, #tpu.memory_space<vmem>>, vector<1x32xf32>
    %92 = vector.broadcast %91 : vector<1x32xf32> to vector<16x32xf32>
    %93 = arith.addf %90, %92 : vector<16x32xf32>
    %cst_67 = arith.constant 0.000000e+00 : f32
    %94 = vector.broadcast %cst_67 : f32 to vector<16x32xf32>
    %95 = arith.maximumf %93, %94 : vector<16x32xf32>
    %96 = arith.truncf %95 : vector<16x32xf32> to vector<16x32xbf16>
    %cst_68 = arith.constant dense<0.000000e+00> : vector<2x32xf32>
    %97 = tpu.matmul %51, %96, %cst_68 {dimension_numbers = #tpu.dot_dimension_numbers<[1], [0], [0], [1], [0, 0, 1, 1], [], []>} : vector<2x16xbf16>, vector<16x32xbf16>, vector<2x32xf32> -> vector<2x32xf32>
    %c0_69 = arith.constant 0 : index
    %c0_70 = arith.constant 0 : index
    %98 = vector.load %arg4[%c0_69, %c0_70] : memref<2x16xf32, #tpu.memory_space<vmem>>, vector<2x16xf32>
    %c600 = arith.constant 600 : index
    %c0_71 = arith.constant 0 : index
    %99 = vector.load %arg5[%c600, %c0_71] : memref<768x128xf32, #tpu.memory_space<vmem>>, vector<32x32xf32>
    %cst_72 = arith.constant dense<0.000000e+00> : vector<2x32xf32>
    %100 = tpu.matmul %48, %99, %cst_72 {dimension_numbers = #tpu.dot_dimension_numbers<[1], [0], [0], [1], [0, 0, 1, 1], [], []>} : vector<2x32xf32>, vector<32x32xf32>, vector<2x32xf32> -> vector<2x32xf32>
    %c632 = arith.constant 632 : index
    %c0_73 = arith.constant 0 : index
    %101 = vector.load %arg5[%c632, %c0_73] : memref<768x128xf32, #tpu.memory_space<vmem>>, vector<32x32xf32>
    %cst_74 = arith.constant dense<0.000000e+00> : vector<2x32xf32>
    %102 = tpu.matmul %97, %101, %cst_74 {dimension_numbers = #tpu.dot_dimension_numbers<[1], [0], [0], [1], [0, 0, 1, 1], [], []>} : vector<2x32xf32>, vector<32x32xf32>, vector<2x32xf32> -> vector<2x32xf32>
    %103 = arith.addf %100, %102 : vector<2x32xf32>
    %c664 = arith.constant 664 : index
    %c0_75 = arith.constant 0 : index
    %104 = vector.load %arg5[%c664, %c0_75] : memref<768x128xf32, #tpu.memory_space<vmem>>, vector<16x32xf32>
    %cst_76 = arith.constant dense<0.000000e+00> : vector<2x32xf32>
    %105 = tpu.matmul %98, %104, %cst_76 {dimension_numbers = #tpu.dot_dimension_numbers<[1], [0], [0], [1], [0, 0, 1, 1], [], []>} : vector<2x16xf32>, vector<16x32xf32>, vector<2x32xf32> -> vector<2x32xf32>
    %106 = arith.addf %103, %105 : vector<2x32xf32>
    %c680 = arith.constant 680 : index
    %c0_77 = arith.constant 0 : index
    %107 = vector.load %arg5[%c680, %c0_77] : memref<768x128xf32, #tpu.memory_space<vmem>>, vector<1x32xf32>
    %108 = vector.broadcast %107 : vector<1x32xf32> to vector<2x32xf32>
    %109 = arith.addf %106, %108 : vector<2x32xf32>
    %cst_78 = arith.constant 0.000000e+00 : f32
    %110 = vector.broadcast %cst_78 : f32 to vector<2x32xf32>
    %111 = arith.maximumf %109, %110 : vector<2x32xf32>
    %c688 = arith.constant 688 : index
    %c0_79 = arith.constant 0 : index
    %112 = vector.load %arg5[%c688, %c0_79] : memref<768x128xf32, #tpu.memory_space<vmem>>, vector<32x32xf32>
    %cst_80 = arith.constant dense<0.000000e+00> : vector<2x32xf32>
    %113 = tpu.matmul %111, %112, %cst_80 {dimension_numbers = #tpu.dot_dimension_numbers<[1], [0], [0], [1], [0, 0, 1, 1], [], []>} : vector<2x32xf32>, vector<32x32xf32>, vector<2x32xf32> -> vector<2x32xf32>
    %c720 = arith.constant 720 : index
    %c0_81 = arith.constant 0 : index
    %114 = vector.load %arg5[%c720, %c0_81] : memref<768x128xf32, #tpu.memory_space<vmem>>, vector<1x32xf32>
    %115 = vector.broadcast %114 : vector<1x32xf32> to vector<2x32xf32>
    %116 = arith.addf %113, %115 : vector<2x32xf32>
    %cst_82 = arith.constant 0.000000e+00 : f32
    %117 = vector.broadcast %cst_82 : f32 to vector<2x32xf32>
    %118 = arith.maximumf %116, %117 : vector<2x32xf32>
    %c728 = arith.constant 728 : index
    %c0_83 = arith.constant 0 : index
    %119 = vector.load %arg5[%c728, %c0_83] : memref<768x128xf32, #tpu.memory_space<vmem>>, vector<32x4xf32>
    %cst_84 = arith.constant dense<0.000000e+00> : vector<2x4xf32>
    %120 = tpu.matmul %118, %119, %cst_84 {dimension_numbers = #tpu.dot_dimension_numbers<[1], [0], [0], [1], [0, 0, 1, 1], [], []>} : vector<2x32xf32>, vector<32x4xf32>, vector<2x4xf32> -> vector<2x4xf32>
    %c760 = arith.constant 760 : index
    %c0_85 = arith.constant 0 : index
    %121 = vector.load %arg5[%c760, %c0_85] : memref<768x128xf32, #tpu.memory_space<vmem>>, vector<1x4xf32>
    %122 = vector.broadcast %121 : vector<1x4xf32> to vector<2x4xf32>
    %123 = arith.addf %120, %122 : vector<2x4xf32>
    %cst_86 = arith.constant dense<0xFF800000> : vector<2xf32>
    %124 = vector.multi_reduction <maximumf>, %123, %cst_86 [1] : vector<2x4xf32> to vector<2xf32>
    %125 = vector.shape_cast %124 : vector<2xf32> to vector<2x1xf32>
    %126 = vector.broadcast %125 : vector<2x1xf32> to vector<2x4xf32>
    %127 = arith.subf %123, %126 : vector<2x4xf32>
    %128 = math.exp %127 : vector<2x4xf32>
    %cst_87 = arith.constant dense<0.000000e+00> : vector<2xf32>
    %129 = vector.multi_reduction <add>, %128, %cst_87 [1] : vector<2x4xf32> to vector<2xf32>
    %130 = vector.shape_cast %129 : vector<2xf32> to vector<2x1xf32>
    %131 = tpu.reciprocal %130 {approx = true} : vector<2x1xf32> -> vector<2x1xf32>
    %132 = vector.broadcast %131 : vector<2x1xf32> to vector<2x4xf32>
    %133 = arith.mulf %128, %132 : vector<2x4xf32>
    %c240 = arith.constant 240 : index
    %c0_88 = arith.constant 0 : index
    %134 = vector.load %arg5[%c240, %c0_88] : memref<768x128xf32, #tpu.memory_space<vmem>>, vector<32x128xf32>
    %cst_89 = arith.constant dense<0.000000e+00> : vector<2x128xf32>
    %135 = tpu.matmul %48, %134, %cst_89 {dimension_numbers = #tpu.dot_dimension_numbers<[1], [0], [0], [1], [0, 0, 1, 1], [], []>} : vector<2x32xf32>, vector<32x128xf32>, vector<2x128xf32> -> vector<2x128xf32>
    %c272 = arith.constant 272 : index
    %c0_90 = arith.constant 0 : index
    %136 = vector.load %arg5[%c272, %c0_90] : memref<768x128xf32, #tpu.memory_space<vmem>>, vector<32x128xf32>
    %cst_91 = arith.constant dense<0.000000e+00> : vector<2x128xf32>
    %137 = tpu.matmul %97, %136, %cst_91 {dimension_numbers = #tpu.dot_dimension_numbers<[1], [0], [0], [1], [0, 0, 1, 1], [], []>} : vector<2x32xf32>, vector<32x128xf32>, vector<2x128xf32> -> vector<2x128xf32>
    %138 = arith.addf %135, %137 : vector<2x128xf32>
    %c304 = arith.constant 304 : index
    %c0_92 = arith.constant 0 : index
    %139 = vector.load %arg5[%c304, %c0_92] : memref<768x128xf32, #tpu.memory_space<vmem>>, vector<16x128xf32>
    %cst_93 = arith.constant dense<0.000000e+00> : vector<2x128xf32>
    %140 = tpu.matmul %98, %139, %cst_93 {dimension_numbers = #tpu.dot_dimension_numbers<[1], [0], [0], [1], [0, 0, 1, 1], [], []>} : vector<2x16xf32>, vector<16x128xf32>, vector<2x128xf32> -> vector<2x128xf32>
    %141 = arith.addf %138, %140 : vector<2x128xf32>
    %c320 = arith.constant 320 : index
    %c0_94 = arith.constant 0 : index
    %142 = vector.load %arg5[%c320, %c0_94] : memref<768x128xf32, #tpu.memory_space<vmem>>, vector<1x128xf32>
    %143 = vector.broadcast %142 : vector<1x128xf32> to vector<2x128xf32>
    %144 = arith.addf %141, %143 : vector<2x128xf32>
    %cst_95 = arith.constant 0.000000e+00 : f32
    %145 = vector.broadcast %cst_95 : f32 to vector<2x128xf32>
    %146 = arith.maximumf %144, %145 : vector<2x128xf32>
    %c328 = arith.constant 328 : index
    %c0_96 = arith.constant 0 : index
    %147 = vector.load %arg5[%c328, %c0_96] : memref<768x128xf32, #tpu.memory_space<vmem>>, vector<128x128xf32>
    %cst_97 = arith.constant dense<0.000000e+00> : vector<2x128xf32>
    %148 = tpu.matmul %146, %147, %cst_97 {dimension_numbers = #tpu.dot_dimension_numbers<[1], [0], [0], [1], [0, 0, 1, 1], [], []>} : vector<2x128xf32>, vector<128x128xf32>, vector<2x128xf32> -> vector<2x128xf32>
    %c456 = arith.constant 456 : index
    %c0_98 = arith.constant 0 : index
    %149 = vector.load %arg5[%c456, %c0_98] : memref<768x128xf32, #tpu.memory_space<vmem>>, vector<1x128xf32>
    %150 = vector.broadcast %149 : vector<1x128xf32> to vector<2x128xf32>
    %151 = arith.addf %148, %150 : vector<2x128xf32>
    %cst_99 = arith.constant 0.000000e+00 : f32
    %152 = vector.broadcast %cst_99 : f32 to vector<2x128xf32>
    %153 = arith.maximumf %151, %152 : vector<2x128xf32>
    %c464 = arith.constant 464 : index
    %c0_100 = arith.constant 0 : index
    %154 = vector.load %arg5[%c464, %c0_100] : memref<768x128xf32, #tpu.memory_space<vmem>>, vector<128x4xf32>
    %cst_101 = arith.constant dense<0.000000e+00> : vector<2x4xf32>
    %155 = tpu.matmul %153, %154, %cst_101 {dimension_numbers = #tpu.dot_dimension_numbers<[1], [0], [0], [1], [0, 0, 1, 1], [], []>} : vector<2x128xf32>, vector<128x4xf32>, vector<2x4xf32> -> vector<2x4xf32>
    %c592 = arith.constant 592 : index
    %c0_102 = arith.constant 0 : index
    %156 = vector.load %arg5[%c592, %c0_102] : memref<768x128xf32, #tpu.memory_space<vmem>>, vector<1x4xf32>
    %157 = vector.broadcast %156 : vector<1x4xf32> to vector<2x4xf32>
    %158 = arith.addf %155, %157 : vector<2x4xf32>
    %159 = arith.mulf %158, %133 : vector<2x4xf32>
    %cst_103 = arith.constant dense<0.000000e+00> : vector<2xf32>
    %160 = vector.multi_reduction <add>, %159, %cst_103 [1] : vector<2x4xf32> to vector<2xf32>
    %161 = vector.shape_cast %160 : vector<2xf32> to vector<2x1xf32>
    %162 = vector.shape_cast %161 : vector<2x1xf32> to vector<2x1xf32>
    %163 = vector.broadcast %162 : vector<2x1xf32> to vector<2x128xf32>
    %c0_104 = arith.constant 0 : index
    %c0_105 = arith.constant 0 : index
    %164 = vector.load %arg6[%c0_104, %c0_105] : memref<2x128xf32, #tpu.memory_space<vmem>>, vector<2x128xf32>
    tpu.vector_store %arg6[%c0_104, %c0_105], %163 {strides = array<i32>} : memref<2x128xf32, #tpu.memory_space<vmem>>, vector<2x128xf32>,
    return
  }
}

</mosaic_0001>

<bundles_post_ra>
// kernel: tpu_custom_call.1
= control target key start
LH: loop header
LB: loop body
LE: loop exit
PB: predicated region body
PF: predicated region fallthrough
CT: control target
= control target key end

     0   :  { %11 = vsyncpa [#allocation3], 0  ;;  %s1671_s0 = inlined_call_operand.vmem [shape: bf16[64,32], index: 0, kind: input, shape index: {}]   ;;  %s1672_s1 = inlined_call_operand.vmem [shape: f32[48,16], index: 1, kind: input, shape index: {}]   ;;  %s1673_s2 = inlined_call_operand.vmem [shape: bf16[64,32], index: 2, kind: input, shape index: {}]   ;;  %s1674_s3 = inlined_call_operand.vmem [shape: f32[48,16], index: 3, kind: input, shape index: {}]   ;;  %s1675_s4 = inlined_call_operand.vmem [shape: f32[2,16], index: 4, kind: input, shape index: {}]   ;;  %s1676_s5 = inlined_call_operand.hbm [shape: f32[768,128], index: 5, kind: input, shape index: {}]   ;;  %s1677_s6 = inlined_call_operand.hbm [shape: f32[2,128], index: 6, kind: output, shape index: {}]  }
   0x1   :  { %12 = vsyncpa [#allocation4], 0  ;;  %s27_s23 = sshll.u32 %s1676_s5, 4  ;;  %s1390_s24 = smov [#allocation2]   ;;  %s28_s23 = int_to_ptr.hbm [resolvable:$true] %s27_s23 }
   0x2   :  { %s29_s25 = sshll.u32 %s1390_s24, 4  ;;  %s1391_s26 = smov 128   ;;  %s30_s25 = int_to_ptr.vmem [resolvable:$true] %s29_s25 }
   0x3   :  { %s1392_s27 = smov 8  }
   0x4   :  { %35 = dma.hbm_to_vmem [thread:$0]  %s28_s23, 12288, %s30_s25, [#allocation3], %s1391_s26, %s1391_s26, %s1392_s27  }
   0x5   :  { %1386 = dma.done.wait [#allocation3], 12288  }
   0x6   :  { %1387 = vsyncadd [#allocation3], 4294955008  ;;  %v1435_v0 = vld [vmem:[%s1672_s1] sm:$0xff]  ;;  %v1440_v1 = vld [vmem:[%s1672_s1 + $0x8] sm:$0xff]  ;;  %vm65_vm0 = vcmask 130048   ;;  %vm192_vm1 = vcmask 261120  }
   0x7   :  { %v1445_v2 = vld [vmem:[%s1671_s0] sm:$0xff]  ;;  %v54_v3 = vpack.c.bf16 %v1440_v1, %v1435_v0  ;;  %v1452_v4 = vld [vmem:[%s1671_s0 + $0x8] sm:$0xff]  ;;  %v94_v7 = vld [vmem:[#allocation2 + $0x18] sm:$0xff]  ;;  %vm1035_vm2 = vcmask 25600  }
   0x8   :  { %v92_v5 = vld [vmem:[#allocation2 + $0x8] sm:$0xff]  ;;  %v91_v6 = vld [vmem:[#allocation2] sm:$0xff]  ;;  %v93_v8 = vld [vmem:[#allocation2 + $0x10] sm:$0xff]  ;;  %121 = vmatpush.msra.mxu1 %v94_v7  ;;  %1320 = vmatpush.msra.mxu3 %v94_v7 }
   0x9   :  { %79 = vmatpush.bf16.msra.mxu0 %v54_v3  ;;  %1319 = vmatpush.bf16.msra.mxu2 %v54_v3  ;;  %v50_v9 = vld [vmem:[%s1672_s1 + $0x10] sm:$0xff]  ;;  %v51_v10 = vld [vmem:[%s1672_s1 + $0x18] sm:$0xff]  ;;  %v52_v11 = vld [vmem:[%s1672_s1 + $0x20] sm:$0xff] }
   0xa   :  { %122 = vmatpush.msra.mxu1 %v93_v8  ;;  %1321 = vmatpush.msra.mxu3 %v93_v8  ;;  %v53_v12 = vld [vmem:[%s1672_s1 + $0x28] sm:$0xff]  ;;  %v1493_v35 = vld [vmem:[%s1671_s0 + $0x10] sm:$0xff]  ;;  %v184_v36 = vld [vmem:[#allocation2 + $0x38] sm:$0xff]  ;;  %s1211_s1 = sshll.u32 %s1677_s6, 4  ;;  %s1212_s1 = int_to_ptr.hbm [resolvable:$true] %s1211_s1 }
   0xb   :  { %1231 = vmatmul.msk.f32.vlgmr.msra.gmra.mxu1 %vm65_vm0, %v50_v9  ;;  %1233 = vmatmul.msk.f32.vlgmr.msra.gmra.mxu3 %vm65_vm0, %v52_v11  ;;  %v183_v37 = vld [vmem:[#allocation2 + $0x30] sm:$0xff]  ;;  %v182_v41 = vld [vmem:[#allocation2 + $0x28] sm:$0xff]  ;;  %v181_v42 = vld [vmem:[#allocation2 + $0x20] sm:$0xff] }
   0xc   :  { %1229 = vmatmul.msk.bf16.vlgmr.msra.gmra.mxu0 %vm65_vm0, %v1445_v2  ;;  %1230 = vmatmul.msk.bf16.vlgmr.msra.gmra.mxu2 %vm65_vm0, %v1452_v4 }
   0xd   :  { %162 = vmatpush.msrb.mxu2 %v92_v5  ;;  %258 = vmatpush.msrb.mxu0 %v184_v36 }
   0xf   :  { %163 = vmatpush.msrb.mxu2 %v91_v6  ;;  %259 = vmatpush.msrb.mxu0 %v183_v37 }
  0x11   :  { %260 = vmatpush.msrb.mxu0 %v182_v41 }
  0x13   :  { %1232 = vmatmul.msk.f32.gmra.mxu1 %vm65_vm0, %v51_v10  ;;  %1234 = vmatmul.msk.f32.gmra.mxu3 %vm65_vm0, %v53_v12 }
  0x14   :  { %261 = vmatpush.msrb.mxu0 %v181_v42 }
  0x88   :  { %v124_v19 = vpop.f32.mrf.mxu1 }
  0x89   :  { %v81_v13 = vpop.f32.mrf.mxu0 }
  0x8a   :  { %1235 = vmatmul.msk.f32.vlgmr.msrb.gmra.mxu2 %vm65_vm0, %v81_v13 }
  0x8e   :  { %v130_v20 = vpop.f32.mrf.mxu3 }
  0x8f   :  { %v86_v15 = vpop.f32.mrf.mxu2 }
  0x90   :  { %v127_v22 = vpop.f32.mrf.mxu1 }
  0x91   :  { %v83_v14 = vpop.f32.mrf.mxu0 }
  0x92   :  { %1236 = vmatmul.msk.f32.gmra.mxu2 %vm65_vm0, %v83_v14 }
  0x96   :  { %v133_v23 = vpop.f32.mrf.mxu3 }
  0x97   :  { %v88_v16 = vpop.f32.mrf.mxu2 }
  0x9a   :  { %1237 = vmatmul.msk.f32.gmra.mxu2 %vm65_vm0, %v86_v15 }
  0xa2   :  { %1238 = vmatmul.msk.f32.gmra.mxu2 %vm65_vm0, %v88_v16  ;;  %v381_v16 = vld [vmem:[#allocation2 + $0x48] sm:$0xff] }
 0x10d   :  { %v165_v17 = vpop.f32.mrf.mxu2 }
 0x10e   :  { %v166_v28 = vadd.f32 %v165_v17, %v124_v19  ;;  %v385_v17 = vld [vmem:[#allocation2 + $0x68] sm:$0xff] }
 0x10f   :  { %404 = vmatpush.msra.mxu0 %v385_v17 }
 0x110   :  { %v1486_v33 = vmax.f32 %v166_v28, 0.0 }
 0x115   :  { %v168_v18 = vpop.f32.mrf.mxu2 }
 0x116   :  { %v169_v26 = vadd.f32 %v168_v18, %v127_v22  ;;  %v384_v18 = vld [vmem:[#allocation2 + $0x60] sm:$0xff] }
 0x117   :  { %405 = vmatpush.msra.mxu0 %v384_v18 }
 0x118   :  { %v1482_v31 = vmax.f32 %v169_v26, 0.0 }
 0x11a   :  { %v185_v34 = vpack.c.bf16 %v1482_v31, %v1486_v33 }
 0x11d   :  { %v171_v21 = vpop.f32.mrf.mxu2 }
 0x11e   :  { %v172_v24 = vadd.f32 %v171_v21, %v130_v20  ;;  %v383_v20 = vld [vmem:[#allocation2 + $0x58] sm:$0xff] }
 0x11f   :  { %406 = vmatpush.msra.mxu0 %v383_v20  ;;  %v1600_v20 = vld [vmem:[%s1673_s2 + $0x10] sm:$0xff] }
 0x120   :  { %v1478_v29 = vmax.f32 %v172_v24, 0.0 }
 0x125   :  { %v174_v25 = vpop.f32.mrf.mxu2 }
 0x126   :  { %v175_v27 = vadd.f32 %v174_v25, %v133_v23 }
 0x128   :  { %v1480_v30 = vmax.f32 %v175_v27, 0.0 }
 0x12a   :  { %v186_v32 = vpack.c.bf16 %v1480_v30, %v1478_v29 }
 0x12c   :  { %202 = vmatpush.bf16.msrb.mxu3 %v186_v32 }
 0x130   :  { %203 = vmatpush.bf16.msrb.mxu3 %v185_v34 }
 0x133   :  { %1243 = vmatmul.msk.bf16.vlgmr.msrb.gmra.mxu3 %vm192_vm1, %v1493_v35 }
 0x1b6   :  { %v205_v38 = vpop.f32.mrf.mxu3 }
 0x1be   :  { %v207_v39 = vpop.f32.mrf.mxu3 }
 0x1bf   :  { %v210_v40 = vpack.c.bf16 %v207_v39, %v205_v38  ;;  %v1557_v38 = vld [vmem:[%s1673_s2 + $0x8] sm:$0xff]  ;;  %v517_v39 = vld [vmem:[#allocation2 + $0x80] sm:$0xff] }
 0x1c1   :  { %218 = vmatpush.bf16.msra.mxu3 %v210_v40  ;;  %v516_v40 = vld [vmem:[#allocation2 + $0x78] sm:$0xff] }
 0x1c4   :  { %1244 = vmatmul.msk.bf16.vlgmr.msra.gmra.mxu3 %vm65_vm0, %v1445_v2 }
 0x1d4   :  { %1245 = vmatmul.msk.bf16.gmra.mxu3 %vm65_vm0, %v1452_v4 }
 0x247   :  { %v220_v43 = vpop.f32.mrf.mxu3 }
 0x248   :  { %v230_v44 = vsub.f32 %v220_v43, %v1478_v29  ;;  %v476_v43 = vld [vmem:[%s1674_s3 + $0x10] sm:$0xff] }
 0x24a   :  { %1246 = vmatmul.msk.f32.vlgmr.msrb.gmra.mxu0 %vm192_vm1, %v230_v44  ;;  %v477_v44 = vld [vmem:[%s1674_s3 + $0x18] sm:$0xff] }
 0x24f   :  { %v222_v45 = vpop.f32.mrf.mxu3 }
 0x250   :  { %v231_v46 = vsub.f32 %v222_v45, %v1480_v30 }
 0x252   :  { %1247 = vmatmul.msk.f32.gmra.mxu0 %vm192_vm1, %v231_v46 }
 0x257   :  { %v225_v47 = vpop.f32.mrf.mxu3 }
 0x258   :  { %v232_v48 = vsub.f32 %v225_v47, %v1486_v33  ;;  %v478_v47 = vld [vmem:[%s1674_s3 + $0x20] sm:$0xff] }
 0x25a   :  { %1248 = vmatmul.msk.f32.gmra.mxu0 %vm192_vm1, %v232_v48 }
 0x25f   :  { %v227_v49 = vpop.f32.mrf.mxu3 }
 0x260   :  { %v233_v50 = vsub.f32 %v227_v49, %v1482_v31  ;;  %v1326_v49 = vld [vmem:[#allocation2 + $0x70] ss:$0 sm:$0xff] }
 0x262   :  { %1249 = vmatmul.msk.f32.gmra.mxu0 %vm192_vm1, %v233_v50 }
 0x2c7   :  { %v263_v51 = vpop.f32.mrf.mxu0 }
 0x2c8   :  { %v264_v58 = vadd.f32 %v263_v51, %v1486_v33 }
 0x2ca   :  { %v275_v63 = vmax.f32 %v264_v58, 0.0 }
 0x2cf   :  { %v266_v52 = vpop.f32.mrf.mxu0 }
 0x2d0   :  { %v267_v56 = vadd.f32 %v266_v52, %v1482_v31 }
 0x2d2   :  { %v276_v61 = vmax.f32 %v267_v56, 0.0 }
 0x2d4   :  { %v279_v3 = vpack.c.bf16 %v276_v61, %v275_v63 }
 0x2d7   :  { %v269_v53 = vpop.f32.mrf.mxu0 }
 0x2d8   :  { %v270_v54 = vadd.f32 %v269_v53, %v1478_v29 }
 0x2da   :  { %v277_v59 = vmax.f32 %v270_v54, 0.0  ;;  %v479_v54 = vld [vmem:[%s1674_s3 + $0x28] sm:$0xff] }
 0x2df   :  { %v272_v55 = vpop.f32.mrf.mxu0 }
 0x2e0   :  { %v273_v57 = vadd.f32 %v272_v55, %v1480_v30 }
 0x2e2   :  { %v278_v60 = vmax.f32 %v273_v57, 0.0 }
 0x2e4   :  { %v280_v62 = vpack.c.bf16 %v278_v60, %v277_v59 }
 0x2e6   :  { %287 = vmatpush.bf16.msrb.mxu1 %v280_v62 }
 0x2ea   :  { %288 = vmatpush.bf16.msrb.mxu1 %v279_v3 }
 0x2ed   :  { %1250 = vmatmul.msk.bf16.vlgmr.msrb.gmra.mxu1 %vm192_vm1, %v1493_v35 }
 0x2ee   :  { %343 = vmatpush.msra.mxu1 %v184_v36 }
 0x2f0   :  { %344 = vmatpush.msra.mxu1 %v183_v37  ;;  %v1550_v37 = vld [vmem:[%s1673_s2] sm:$0xff] }
 0x2f2   :  { %345 = vmatpush.msra.mxu1 %v182_v41  ;;  %v519_v41 = vld [vmem:[#allocation2 + $0x90] sm:$0xff] }
 0x2f4   :  { %346 = vmatpush.msra.mxu1 %v181_v42  ;;  %v518_v42 = vld [vmem:[#allocation2 + $0x88] sm:$0xff] }
 0x2f6   :  { %546 = vmatpush.msrb.mxu1 %v519_v41 }
 0x2f8   :  { %547 = vmatpush.msrb.mxu1 %v518_v42 }
 0x36a   :  { %v290_v5 = vpop.f32.mrf.mxu1 }
 0x372   :  { %v292_v6 = vpop.f32.mrf.mxu1 }
 0x373   :  { %v295_v7 = vpack.c.bf16 %v292_v6, %v290_v5 }
 0x375   :  { %303 = vmatpush.bf16.msra.mxu2 %v295_v7 }
 0x378   :  { %1251 = vmatmul.msk.bf16.vlgmr.msra.gmra.mxu2 %vm65_vm0, %v1445_v2 }
 0x379   :  { %435 = vmatpush.msrb.mxu2 %v381_v16 }
 0x388   :  { %1252 = vmatmul.msk.bf16.gmra.mxu2 %vm65_vm0, %v1452_v4  ;;  %v380_v4 = vld [vmem:[#allocation2 + $0x40] sm:$0xff] }
 0x389   :  { %436 = vmatpush.msrb.mxu2 %v380_v4 }
 0x38b   :  { %587 = vmatpush.msra.mxu2 %v517_v39 }
 0x38d   :  { %588 = vmatpush.msra.mxu2 %v516_v40 }
 0x398   :  { %1260 = vmatmul.msk.f32.vlgmr.msrb.gmra.mxu2 %vm65_vm0, %v1435_v0 }
 0x3a0   :  { %1261 = vmatmul.msk.f32.gmra.mxu2 %vm65_vm0, %v1440_v1  ;;  %v382_v1 = vld [vmem:[#allocation2 + $0x50] sm:$0xff] }
 0x3a1   :  { %407 = vmatpush.msra.mxu0 %v382_v1 }
 0x3fb   :  { %v305_v8 = vpop.f32.mrf.mxu2 }
 0x3fc   :  { %v315_v9 = vsub.f32 %v305_v8, %v277_v59 }
 0x3fe   :  { %1253 = vmatmul.msk.f32.vlgmr.msra.gmra.mxu1 %vm192_vm1, %v315_v9 }
 0x403   :  { %v307_v10 = vpop.f32.mrf.mxu2 }
 0x404   :  { %v316_v11 = vsub.f32 %v307_v10, %v278_v60 }
 0x406   :  { %1254 = vmatmul.msk.f32.gmra.mxu1 %vm192_vm1, %v316_v11 }
 0x40b   :  { %v310_v12 = vpop.f32.mrf.mxu2 }
 0x40c   :  { %v317_v13 = vsub.f32 %v310_v12, %v275_v63  ;;  %v47_v63 = vld [vmem:[%s1671_s0 + $0x18] sm:$0x1] }
 0x40e   :  { %1255 = vmatmul.msk.f32.gmra.mxu1 %vm192_vm1, %v317_v13 }
 0x413   :  { %v312_v14 = vpop.f32.mrf.mxu2 }
 0x414   :  { %v318_v15 = vsub.f32 %v312_v14, %v276_v61 }
 0x416   :  { %1256 = vmatmul.msk.f32.gmra.mxu1 %vm192_vm1, %v318_v15 }
 0x41b   :  { %v438_v45 = vpop.f32.mrf.mxu2 }
 0x41e   :  { %1273 = vmatmul.msk.f32.vlgmr.msrb.gmra.mxu1 %vm65_vm0, %v476_v43 }
 0x423   :  { %v441_v50 = vpop.f32.mrf.mxu2 }
 0x426   :  { %1274 = vmatmul.msk.f32.gmra.mxu1 %vm65_vm0, %v477_v44 }
 0x42e   :  { %1275 = vmatmul.msk.f32.gmra.mxu1 %vm65_vm0, %v478_v47 }
 0x436   :  { %1276 = vmatmul.msk.f32.gmra.mxu1 %vm65_vm0, %v479_v54 }
 0x47b   :  { %v348_v2 = vpop.f32.mrf.mxu1 }
 0x47c   :  { %v349_v26 = vadd.f32 %v348_v2, %v1486_v33 }
 0x47e   :  { %v360_v36 = vmax.f32 %v349_v26, 0.0 }
 0x483   :  { %v351_v19 = vpop.f32.mrf.mxu1 }
 0x484   :  { %v352_v24 = vadd.f32 %v351_v19, %v1482_v31 }
 0x486   :  { %v361_v32 = vmax.f32 %v352_v24, 0.0  ;;  %v608_v24 = vld [vmem:[#allocation2 + $0xa8] sm:$0xff] }
 0x488   :  { %v364_v0 = vpack.c.bf16 %v361_v32, %v360_v36  ;;  %v606_v32 = vld [vmem:[#allocation2 + $0x98] sm:$0xff] }
 0x48b   :  { %v354_v21 = vpop.f32.mrf.mxu1 }
 0x48c   :  { %v355_v22 = vadd.f32 %v354_v21, %v1478_v29  ;;  %v1536_v29 = vld [vmem:[%s1674_s3] sm:$0xff] }
 0x48e   :  { %v362_v27 = vmax.f32 %v355_v22, 0.0 }
 0x493   :  { %v357_v23 = vpop.f32.mrf.mxu1 }
 0x494   :  { %v358_v25 = vadd.f32 %v357_v23, %v1480_v30  ;;  %v1541_v30 = vld [vmem:[%s1674_s3 + $0x8] sm:$0xff]  ;;  %v609_v23 = vld [vmem:[#allocation2 + $0xb0] sm:$0xff] }
 0x495   :  { %v480_v31 = vpack.c.bf16 %v1541_v30, %v1536_v29 }
 0x496   :  { %v363_v28 = vmax.f32 %v358_v25, 0.0 }
 0x497   :  { %504 = vmatpush.bf16.msrb.mxu0 %v480_v31 }
 0x498   :  { %v365_v34 = vpack.c.bf16 %v363_v28, %v362_v27  ;;  %v607_v28 = vld [vmem:[#allocation2 + $0xa0] sm:$0xff] }
 0x49a   :  { %372 = vmatpush.bf16.msrb.mxu3 %v365_v34 }
 0x49b   :  { %v549_v3 = vpop.f32.mrf.mxu1 }
 0x49e   :  { %373 = vmatpush.bf16.msrb.mxu3 %v364_v0 }
 0x4a1   :  { %1257 = vmatmul.msk.bf16.vlgmr.msrb.gmra.mxu3 %vm192_vm1, %v1493_v35 }
 0x4a3   :  { %v552_v6 = vpop.f32.mrf.mxu1 }
 0x4ab   :  { %v555_v8 = vpop.f32.mrf.mxu1 }
 0x4b3   :  { %v558_v10 = vpop.f32.mrf.mxu1 }
 0x524   :  { %v375_v33 = vpop.f32.mrf.mxu3 }
 0x525   :  { %1258 = vmatmul.msk.f32.vlgmr.msra.gmra.mxu0 %vm192_vm1, %v375_v33 }
 0x526   :  { %682 = vmatpush.msra.mxu0 %v609_v23 }
 0x528   :  { %683 = vmatpush.msra.mxu0 %v608_v24 }
 0x52a   :  { %684 = vmatpush.msra.mxu0 %v607_v28 }
 0x52c   :  { %v377_v35 = vpop.f32.mrf.mxu3  ;;  %685 = vmatpush.msra.mxu0 %v606_v32 }
 0x52d   :  { %1259 = vmatmul.msk.f32.gmra.mxu0 %vm192_vm1, %v377_v35 }
 0x535   :  { %1271 = vmatmul.msk.bf16.vlgmr.msrb.gmra.mxu0 %vm65_vm0, %v1550_v37 }
 0x545   :  { %1272 = vmatmul.msk.bf16.gmra.mxu0 %vm65_vm0, %v1557_v38 }
 0x5a2   :  { %v409_v46 = vpop.f32.mrf.mxu0 }
 0x5a3   :  { %v439_v48 = vadd.f32 %v438_v45, %v409_v46 }
 0x5a5   :  { %v446_v52 = vadd.f32 %v1326_v49, %v439_v48 }
 0x5a7   :  { %v448_v56 = vmax.f32 %v446_v52, 0.0 }
 0x5aa   :  { %v412_v51 = vpop.f32.mrf.mxu0 }
 0x5ab   :  { %v442_v53 = vadd.f32 %v441_v50, %v412_v51 }
 0x5ad   :  { %v447_v55 = vadd.f32 %v1326_v49, %v442_v53 }
 0x5af   :  { %v449_v57 = vmax.f32 %v447_v55, 0.0 }
 0x5b1   :  { %v450_v58 = vpack.c.bf16 %v449_v57, %v448_v56  ;;  %v805_v57 = vld [vmem:[#allocation2 + $0xc0] sm:$0xff] }
 0x5b2   :  { %v506_v59 = vpop.f32.mrf.mxu0 }
 0x5b3   :  { %461 = vmatpush.bf16.msra.mxu3 %v450_v58  ;;  %1277 = vmatmul.msk.f32.vlgmr.msra.gmra.mxu2 %vm65_vm0, %v506_v59  ;;  %v804_v58 = vld [vmem:[#allocation2 + $0xb8] sm:$0xff]  ;;  %v947_v59 = vld [vmem:[#allocation2 + $0x2a0] sm:$0xff] }
 0x5b6   :  { %1262 = vmatmul.msk.bf16.vlgmr.msra.gmra.mxu3 %vm65_vm0, %v47_v63  ;;  %v1048_v63 = vld [vmem:[#allocation2 + $0xf8] sm:$0xff] }
 0x5ba   :  { %v508_v60 = vpop.f32.mrf.mxu0 }
 0x5bb   :  { %1278 = vmatmul.msk.f32.gmra.mxu2 %vm65_vm0, %v508_v60  ;;  %v946_v60 = vld [vmem:[#allocation2 + $0x298] sm:$0xff] }
 0x5c2   :  { %v511_v61 = vpop.f32.mrf.mxu0 }
 0x5c3   :  { %1279 = vmatmul.msk.f32.gmra.mxu2 %vm65_vm0, %v511_v61  ;;  %v1050_v61 = vld [vmem:[#allocation2 + $0x108] sm:$0xff] }
 0x5ca   :  { %v513_v62 = vpop.f32.mrf.mxu0 }
 0x5cb   :  { %1280 = vmatmul.msk.f32.gmra.mxu2 %vm65_vm0, %v513_v62  ;;  %v1049_v62 = vld [vmem:[#allocation2 + $0x100] sm:$0xff] }
 0x636   :  { %v590_v5 = vpop.f32.mrf.mxu2 }
 0x637   :  { %v591_v15 = vadd.f32 %v590_v5, %v549_v3  ;;  %v1047_v3 = vld [vmem:[#allocation2 + $0xf0] sm:$0xff]  ;;  %v893_v5 = vld [vmem:[#allocation2 + $0x260] sm:$0xff] }
 0x639   :  { %v1593_v18 = vmax.f32 %v591_v15, 0.0  ;;  %v1604_v21 = vpop.f32.mrf.mxu3  ;;  %v809_v15 = vld [vmem:[#allocation2 + $0xe0] sm:$0xff] }
 0x63a   :  { %828 = vmatpush.msrb.mxu0 %v809_v15  ;;  %v1131_v15 = vld [vmem:[#allocation2 + $0x190] sm:$0xff] }
 0x63e   :  { %v593_v7 = vpop.f32.mrf.mxu2 }
 0x63f   :  { %v594_v13 = vadd.f32 %v593_v7, %v552_v6  ;;  %v892_v7 = vld [vmem:[#allocation2 + $0x258] sm:$0xff] }
 0x641   :  { %v1589_v17 = vmax.f32 %v594_v13, 0.0  ;;  %v465_v22 = vpop.f32.mrf.mxu3 }
 0x642   :  { %v807_v22 = vld [vmem:[#allocation2 + $0xd0] sm:$0xff] }
 0x643   :  { %v610_v19 = vpack.c.bf16 %v1589_v17, %v1593_v18 }
 0x646   :  { %v596_v9 = vpop.f32.mrf.mxu2 }
 0x647   :  { %v597_v11 = vadd.f32 %v596_v9, %v555_v8 }
 0x649   :  { %v1585_v2 = vmax.f32 %v597_v11, 0.0 }
 0x64e   :  { %v599_v12 = vpop.f32.mrf.mxu2 }
 0x64f   :  { %v600_v14 = vadd.f32 %v599_v12, %v558_v10 }
 0x651   :  { %v1587_v16 = vmax.f32 %v600_v14, 0.0 }
 0x653   :  { %v611_v4 = vpack.c.bf16 %v1587_v16, %v1585_v2 }
 0x655   :  { %626 = vmatpush.bf16.msrb.mxu3 %v611_v4  ;;  %v808_v4 = vld [vmem:[#allocation2 + $0xd8] sm:$0xff] }
 0x656   :  { %829 = vmatpush.msrb.mxu0 %v808_v4 }
 0x658   :  { %830 = vmatpush.msrb.mxu0 %v807_v22 }
 0x659   :  { %627 = vmatpush.bf16.msrb.mxu3 %v610_v19 }
 0x65c   :  { %1285 = vmatmul.msk.bf16.vlgmr.msrb.gmra.mxu3 %vm192_vm1, %v1600_v20 }
 0x6df   :  { %v629_v25 = vpop.f32.mrf.mxu3 }
 0x6e7   :  { %v631_v26 = vpop.f32.mrf.mxu3 }
 0x6e8   :  { %v634_v27 = vpack.c.bf16 %v631_v26, %v629_v25 }
 0x6ea   :  { %642 = vmatpush.bf16.msra.mxu3 %v634_v27 }
 0x6ed   :  { %1286 = vmatmul.msk.bf16.vlgmr.msra.gmra.mxu3 %vm65_vm0, %v1550_v37 }
 0x6fd   :  { %1287 = vmatmul.msk.bf16.gmra.mxu3 %vm65_vm0, %v1557_v38 }
 0x770   :  { %v644_v34 = vpop.f32.mrf.mxu3 }
 0x771   :  { %v654_v36 = vsub.f32 %v644_v34, %v1585_v2 }
 0x773   :  { %1288 = vmatmul.msk.f32.vlgmr.msra.gmra.mxu0 %vm192_vm1, %v654_v36 }
 0x778   :  { %v646_v0 = vpop.f32.mrf.mxu3 }
 0x779   :  { %v655_v1 = vsub.f32 %v646_v0, %v1587_v16 }
 0x77b   :  { %1289 = vmatmul.msk.f32.gmra.mxu0 %vm192_vm1, %v655_v1 }
 0x780   :  { %v649_v31 = vpop.f32.mrf.mxu3 }
 0x781   :  { %v656_v33 = vsub.f32 %v649_v31, %v1593_v18  ;;  %v806_v31 = vld [vmem:[#allocation2 + $0xc8] sm:$0xff] }
 0x782   :  { %831 = vmatpush.msrb.mxu0 %v806_v31  ;;  %v1172_v31 = vld [vmem:[#allocation2 + $0x228] sm:$0xff] }
 0x783   :  { %1290 = vmatmul.msk.f32.gmra.mxu0 %vm192_vm1, %v656_v33  ;;  %v898_v33 = vld [vmem:[#allocation2 + $0x288] sm:$0xff] }
 0x788   :  { %v651_v35 = vpop.f32.mrf.mxu3 }
 0x789   :  { %v657_v39 = vsub.f32 %v651_v35, %v1589_v17  ;;  %v1053_v35 = vld [vmem:[#allocation2 + $0x120] sm:$0xff] }
 0x78b   :  { %1291 = vmatmul.msk.f32.gmra.mxu0 %vm192_vm1, %v657_v39  ;;  %v897_v39 = vld [vmem:[#allocation2 + $0x280] sm:$0xff] }
 0x7f0   :  { %v687_v40 = vpop.f32.mrf.mxu0 }
 0x7f1   :  { %v688_v47 = vadd.f32 %v687_v40, %v1593_v18  ;;  %v1052_v40 = vld [vmem:[#allocation2 + $0x118] sm:$0xff] }
 0x7f3   :  { %v699_v52 = vmax.f32 %v688_v47, 0.0 }
 0x7f8   :  { %v690_v41 = vpop.f32.mrf.mxu0 }
 0x7f9   :  { %v691_v45 = vadd.f32 %v690_v41, %v1589_v17 }
 0x7fb   :  { %v700_v50 = vmax.f32 %v691_v45, 0.0 }
 0x7fd   :  { %v703_v53 = vpack.c.bf16 %v700_v50, %v699_v52 }
 0x800   :  { %v693_v42 = vpop.f32.mrf.mxu0 }
 0x801   :  { %v694_v43 = vadd.f32 %v693_v42, %v1585_v2 }
 0x803   :  { %v701_v48 = vmax.f32 %v694_v43, 0.0  ;;  %v1327_v43 = vld [vmem:[#allocation2 + $0xe8] ss:$0 sm:$0xff] }
 0x808   :  { %v696_v44 = vpop.f32.mrf.mxu0 }
 0x809   :  { %v697_v46 = vadd.f32 %v696_v44, %v1587_v16 }
 0x80b   :  { %v702_v49 = vmax.f32 %v697_v46, 0.0 }
 0x80d   :  { %v704_v51 = vpack.c.bf16 %v702_v49, %v701_v48 }
 0x80f   :  { %711 = vmatpush.bf16.msra.mxu1 %v704_v51 }
 0x813   :  { %712 = vmatpush.bf16.msra.mxu1 %v703_v53  ;;  %v896_v53 = vld [vmem:[#allocation2 + $0x278] sm:$0xff] }
 0x816   :  { %1292 = vmatmul.msk.bf16.vlgmr.msra.gmra.mxu1 %vm192_vm1, %v1600_v20 }
 0x817   :  { %767 = vmatpush.msrb.mxu1 %v609_v23 }
 0x819   :  { %768 = vmatpush.msrb.mxu1 %v608_v24 }
 0x81b   :  { %769 = vmatpush.msrb.mxu1 %v607_v28 }
 0x81d   :  { %770 = vmatpush.msrb.mxu1 %v606_v32 }
 0x893   :  { %v714_v54 = vpop.f32.mrf.mxu1 }
 0x89b   :  { %v716_v55 = vpop.f32.mrf.mxu1 }
 0x89c   :  { %v719_v56 = vpack.c.bf16 %v716_v55, %v714_v54  ;;  %v1051_v54 = vld [vmem:[#allocation2 + $0x110] sm:$0xff] }
 0x89e   :  { %727 = vmatpush.bf16.msrb.mxu2 %v719_v56 }
 0x8a1   :  { %1293 = vmatmul.msk.bf16.vlgmr.msrb.gmra.mxu2 %vm65_vm0, %v1550_v37  ;;  %v1635_v37 = vld [vmem:[%s1675_s4] sm:$0x3] }
 0x8a2   :  { %859 = vmatpush.msra.mxu2 %v805_v57  ;;  %v979_v57 = vld [vmem:[#allocation2 + $0x2c8] sm:$0xff] }
 0x8a4   :  { %860 = vmatpush.msra.mxu2 %v804_v58  ;;  %v978_v58 = vld [vmem:[#allocation2 + $0x2c0] sm:$0xff] }
 0x8a6   :  { %965 = vmatpush.msrb.mxu2 %v947_v59  ;;  %v977_v59 = vld [vmem:[#allocation2 + $0x2b8] sm:$0xff] }
 0x8a8   :  { %966 = vmatpush.msrb.mxu2 %v946_v60  ;;  %v976_v60 = vld [vmem:[#allocation2 + $0x2b0] sm:$0xff] }
 0x8b1   :  { %1294 = vmatmul.msk.bf16.gmra.mxu2 %vm65_vm0, %v1557_v38  ;;  %v894_v38 = vld [vmem:[#allocation2 + $0x268] sm:$0xff] }
 0x8c1   :  { %1302 = vmatmul.msk.f32.vlgmr.msra.gmra.mxu2 %vm65_vm0, %v1536_v29  ;;  %v895_v29 = vld [vmem:[#allocation2 + $0x270] sm:$0xff] }
 0x8c2   :  { %1087 = vmatpush.msra.mxu2 %v1050_v61  ;;  %938 = vmatpush.msra.mxu1 %v895_v29  ;;  %v1096_v61 = vld [vmem:[#allocation2 + $0x138] sm:$0xff]  ;;  %v1007_v29 = vld [vmem:[#allocation2 + $0x2e0] sm:$0xff] }
 0x8c4   :  { %1088 = vmatpush.msra.mxu2 %v1049_v62  ;;  %939 = vmatpush.msra.mxu1 %v894_v38  ;;  %v1095_v62 = vld [vmem:[#allocation2 + $0x130] sm:$0xff]  ;;  %v1006_v38 = vld [vmem:[#allocation2 + $0x2d8] sm:$0xff] }
 0x8c6   :  { %1089 = vmatpush.msra.mxu2 %v1048_v63  ;;  %940 = vmatpush.msra.mxu1 %v893_v5  ;;  %v1009_v63 = vld [vmem:[#allocation2 + $0x2f0] sm:$0xff]  ;;  %v1137_v5 = vld [vmem:[#allocation2 + $0x1c0] sm:$0xff] }
 0x8c8   :  { %1090 = vmatpush.msra.mxu2 %v1047_v3  ;;  %941 = vmatpush.msra.mxu1 %v892_v7  ;;  %v1008_v3 = vld [vmem:[#allocation2 + $0x2e8] sm:$0xff]  ;;  %v1135_v7 = vld [vmem:[#allocation2 + $0x1b0] sm:$0xff] }
 0x8c9   :  { %1303 = vmatmul.msk.f32.gmra.mxu2 %vm65_vm0, %v1541_v30 }
 0x8d1   :  { %1307 = vmatmul.msk.f32.vlgmr.msrb.gmra.mxu2 %vm65_vm0, %v1635_v37 }
 0x8d9   :  { %1311 = vmatmul.msk.f32.vlgmr.msra.gmra.mxu2 %vm192_vm1, %v1604_v21 }
 0x924   :  { %v729_v6 = vpop.f32.mrf.mxu2 }
 0x925   :  { %v739_v30 = vsub.f32 %v729_v6, %v701_v48  ;;  %v1136_v6 = vld [vmem:[#allocation2 + $0x1b8] sm:$0xff] }
 0x927   :  { %1295 = vmatmul.msk.f32.vlgmr.msrb.gmra.mxu1 %vm192_vm1, %v739_v30  ;;  %v1134_v30 = vld [vmem:[#allocation2 + $0x1a8] sm:$0xff] }
 0x92c   :  { %v731_v8 = vpop.f32.mrf.mxu2 }
 0x92d   :  { %v740_v9 = vsub.f32 %v731_v8, %v702_v49  ;;  %v1133_v8 = vld [vmem:[#allocation2 + $0x1a0] sm:$0xff] }
 0x92f   :  { %1296 = vmatmul.msk.f32.gmra.mxu1 %vm192_vm1, %v740_v9 }
 0x934   :  { %v734_v10 = vpop.f32.mrf.mxu2 }
 0x935   :  { %v741_v11 = vsub.f32 %v734_v10, %v699_v52  ;;  %v473_v52 = vld [vmem:[%s1673_s2 + $0x18] sm:$0x1]  ;;  %s1393_s2 = smov [#allocation5]  }
 0x936   :  { %s1209_s16 = sshll.u32 %s1393_s2, 4  ;;  %s1210_s16 = int_to_ptr.vmem [resolvable:$true] %s1209_s16 }
 0x937   :  { %1297 = vmatmul.msk.f32.gmra.mxu1 %vm192_vm1, %v741_v11  ;;  %v1132_v11 = vld [vmem:[#allocation2 + $0x198] sm:$0xff] }
 0x93c   :  { %v736_v12 = vpop.f32.mrf.mxu2 }
 0x93d   :  { %v742_v13 = vsub.f32 %v736_v12, %v700_v50 }
 0x93f   :  { %1298 = vmatmul.msk.f32.gmra.mxu1 %vm192_vm1, %v742_v13  ;;  %v1328_v13 = vld [vmem:[#allocation2 + $0x2a8] ss:$0 sm:$0xff] }
 0x947   :  { %1306 = vmatmul.msk.f32.vlgmr.msra.gmra.mxu1 %vm192_vm1, %v1604_v21 }
 0x9a4   :  { %v772_v14 = vpop.f32.mrf.mxu1 }
 0x9a5   :  { %v773_v28 = vadd.f32 %v772_v14, %v1593_v18  ;;  %v1054_v18 = vld [vmem:[#allocation2 + $0x128] sm:$0xff] }
 0x9a6   :  { %1067 = vmatpush.msrb.mxu1 %v1054_v18  ;;  %v1329_v18 = vld [vmem:[#allocation2 + $0x2d0] ss:$0 sm:$0xff] }
 0x9a7   :  { %v784_v0 = vmax.f32 %v773_v28, 0.0  ;;  %v1125_v28 = vld [vmem:[#allocation2 + $0x160] sm:$0xff] }
 0x9a8   :  { %1068 = vmatpush.msrb.mxu1 %v1053_v35 }
 0x9aa   :  { %1069 = vmatpush.msrb.mxu1 %v1052_v40 }
 0x9ac   :  { %v775_v19 = vpop.f32.mrf.mxu1  ;;  %1070 = vmatpush.msrb.mxu1 %v1051_v54  ;;  %v1161_v54 = vld [vmem:[#allocation2 + $0x1d0] sm:$0xff] }
 0x9ad   :  { %v776_v26 = vadd.f32 %v775_v19, %v1589_v17  ;;  %v1130_v19 = vld [vmem:[#allocation2 + $0x188] sm:$0xff] }
 0x9af   :  { %v785_v34 = vmax.f32 %v776_v26, 0.0  ;;  %v1127_v26 = vld [vmem:[#allocation2 + $0x170] sm:$0xff] }
 0x9b1   :  { %v788_v1 = vpack.c.bf16 %v785_v34, %v784_v0  ;;  %v1122_v34 = vld [vmem:[#allocation2 + $0x148] sm:$0xff]  ;;  %v1175_v0 = vld [vmem:[#allocation2 + $0x240] sm:$0xff] }
 0x9b4   :  { %v778_v23 = vpop.f32.mrf.mxu1 }
 0x9b5   :  { %v779_v24 = vadd.f32 %v778_v23, %v1585_v2 }
 0x9b7   :  { %v786_v32 = vmax.f32 %v779_v24, 0.0  ;;  %v1129_v24 = vld [vmem:[#allocation2 + $0x180] sm:$0xff] }
 0x9bc   :  { %v781_v25 = vpop.f32.mrf.mxu1 }
 0x9bd   :  { %v782_v27 = vadd.f32 %v781_v25, %v1587_v16  ;;  %v899_v16 = vld [vmem:[#allocation2 + $0x290] sm:$0xff]  ;;  %v1128_v25 = vld [vmem:[#allocation2 + $0x178] sm:$0xff] }
 0x9be   :  { %915 = vmatpush.msra.mxu0 %v899_v16  ;;  %v1169_v16 = vld [vmem:[#allocation2 + $0x210] sm:$0xff] }
 0x9bf   :  { %v787_v21 = vmax.f32 %v782_v27, 0.0  ;;  %v1126_v27 = vld [vmem:[#allocation2 + $0x168] sm:$0xff] }
 0x9c0   :  { %916 = vmatpush.msra.mxu0 %v898_v33 }
 0x9c1   :  { %v789_v36 = vpack.c.bf16 %v787_v21, %v786_v32  ;;  %v1124_v32 = vld [vmem:[#allocation2 + $0x158] sm:$0xff]  ;;  %v1123_v21 = vld [vmem:[#allocation2 + $0x150] sm:$0xff] }
 0x9c2   :  { %917 = vmatpush.msra.mxu0 %v897_v39 }
 0x9c3   :  { %796 = vmatpush.bf16.msrb.mxu3 %v789_v36  ;;  %v1176_v36 = vld [vmem:[#allocation2 + $0x248] sm:$0xff] }
 0x9c4   :  { %918 = vmatpush.msra.mxu0 %v896_v53  ;;  %v943_v9 = vpop.f32.mrf.mxu1  ;;  %1179 = vmatpush.msra.mxu1 %v1176_v36  ;;  %v1162_v53 = vld [vmem:[#allocation2 + $0x1d8] sm:$0xff] }
 0x9c6   :  { %1180 = vmatpush.msra.mxu1 %v1175_v0 }
 0x9c7   :  { %797 = vmatpush.bf16.msrb.mxu3 %v788_v1  ;;  %v1173_v1 = vld [vmem:[#allocation2 + $0x230] sm:$0xff] }
 0x9ca   :  { %1299 = vmatmul.msk.bf16.vlgmr.msrb.gmra.mxu3 %vm192_vm1, %v1600_v20  ;;  %v862_v20 = vpop.f32.mrf.mxu2 }
 0x9d2   :  { %v865_v44 = vpop.f32.mrf.mxu2 }
 0x9da   :  { %v968_v14 = vpop.f32.mrf.mxu2 }
 0xa4d   :  { %v799_v2 = vpop.f32.mrf.mxu3 }
 0xa4e   :  { %1300 = vmatmul.msk.f32.vlgmr.msrb.gmra.mxu0 %vm192_vm1, %v799_v2  ;;  %v1171_v2 = vld [vmem:[#allocation2 + $0x220] sm:$0xff] }
 0xa4f   :  { %1027 = vmatpush.msrb.mxu0 %v1009_v63 }
 0xa51   :  { %1028 = vmatpush.msrb.mxu0 %v1008_v3 }
 0xa53   :  { %1029 = vmatpush.msrb.mxu0 %v1007_v29 }
 0xa55   :  { %v801_v17 = vpop.f32.mrf.mxu3  ;;  %1030 = vmatpush.msrb.mxu0 %v1006_v38 }
 0xa56   :  { %1301 = vmatmul.msk.f32.gmra.mxu0 %vm192_vm1, %v801_v17  ;;  %v1170_v17 = vld [vmem:[#allocation2 + $0x218] sm:$0xff] }
 0xacb   :  { %v833_v41 = vpop.f32.mrf.mxu0 }
 0xacc   :  { %v863_v42 = vadd.f32 %v862_v20, %v833_v41  ;;  %v1092_v20 = vpop.f32.mrf.mxu2 }
 0xace   :  { %v870_v46 = vadd.f32 %v1327_v43, %v863_v42  ;;  %v1330_v42 = vld [vmem:[#allocation2 + $0x140] ss:$0 sm:$0xff] }
 0xad0   :  { %v872_v49 = vmax.f32 %v870_v46, 0.0 }
 0xad3   :  { %v836_v45 = vpop.f32.mrf.mxu0 }
 0xad4   :  { %v866_v47 = vadd.f32 %v865_v44, %v836_v45 }
 0xad6   :  { %v871_v48 = vadd.f32 %v1327_v43, %v866_v47  ;;  %v1168_v47 = vld [vmem:[#allocation2 + $0x208] sm:$0xff] }
 0xad8   :  { %v873_v50 = vmax.f32 %v871_v48, 0.0  ;;  %v1167_v48 = vld [vmem:[#allocation2 + $0x200] sm:$0xff] }
 0xada   :  { %v874_v51 = vpack.c.bf16 %v873_v50, %v872_v49  ;;  %v1166_v49 = vld [vmem:[#allocation2 + $0x1f8] sm:$0xff]  ;;  %v1165_v50 = vld [vmem:[#allocation2 + $0x1f0] sm:$0xff] }
 0xadc   :  { %885 = vmatpush.bf16.msra.mxu3 %v874_v51  ;;  %v1164_v51 = vld [vmem:[#allocation2 + $0x1e8] sm:$0xff] }
 0xadf   :  { %1304 = vmatmul.msk.bf16.vlgmr.msra.gmra.mxu3 %vm65_vm0, %v473_v52  ;;  %v1163_v52 = vld [vmem:[#allocation2 + $0x1e0] sm:$0xff] }
 0xae0   :  { %997 = vmatpush.msrb.mxu3 %v979_v57 }
 0xae2   :  { %998 = vmatpush.msrb.mxu3 %v978_v58 }
 0xae4   :  { %999 = vmatpush.msrb.mxu3 %v977_v59  ;;  %v1332_v59 = vld [vmem:[#allocation2 + $0x1c8] ss:$0 sm:$0xff] }
 0xae6   :  { %1000 = vmatpush.msrb.mxu3 %v976_v60 }
 0xae8   :  { %1111 = vmatpush.msra.mxu3 %v1096_v61 }
 0xaea   :  { %1112 = vmatpush.msra.mxu3 %v1095_v62 }
 0xb62   :  { %v887_v55 = vpop.f32.mrf.mxu3 }
 0xb63   :  { %1305 = vmatmul.msk.f32.vlgmr.msra.gmra.mxu0 %vm192_vm1, %v887_v55  ;;  %1310 = vmatmul.msk.f32.vlgmr.msrb.gmra.mxu1 %vm192_vm1, %v887_v55  ;;  %v1331_v55 = vld [vmem:[#allocation2 + $0x2f8] ss:$0 sm:$0xff] }
 0xb64   :  { %1140 = vmatpush.msra.mxu0 %v1137_v5 }
 0xb66   :  { %1141 = vmatpush.msra.mxu0 %v1136_v6 }
 0xb68   :  { %1142 = vmatpush.msra.mxu0 %v1135_v7  ;;  %v1333_v7 = vld [vmem:[#allocation2 + $0x250] ss:$0 sm:$0xff] }
 0xb6a   :  { %v889_v56 = vpop.f32.mrf.mxu3  ;;  %1143 = vmatpush.msra.mxu0 %v1134_v30 }
 0xb6c   :  { %1144 = vmatpush.msra.mxu0 %v1133_v8 }
 0xb6e   :  { %1145 = vmatpush.msra.mxu0 %v1132_v11 }
 0xb70   :  { %1146 = vmatpush.msra.mxu0 %v1131_v15 }
 0xb72   :  { %1147 = vmatpush.msra.mxu0 %v1130_v19 }
 0xb74   :  { %1148 = vmatpush.msra.mxu0 %v1129_v24 }
 0xb76   :  { %1149 = vmatpush.msra.mxu0 %v1128_v25 }
 0xb78   :  { %1150 = vmatpush.msra.mxu0 %v1127_v26 }
 0xb7a   :  { %1151 = vmatpush.msra.mxu0 %v1126_v27 }
 0xb7c   :  { %1152 = vmatpush.msra.mxu0 %v1125_v28 }
 0xb7e   :  { %1153 = vmatpush.msra.mxu0 %v1124_v32 }
 0xb80   :  { %1154 = vmatpush.msra.mxu0 %v1123_v21 }
 0xb82   :  { %1155 = vmatpush.msra.mxu0 %v1122_v34 }
 0xbe0   :  { %v920_v10 = vpop.f32.mrf.mxu0  ;;  %v1072_v40 = vpop.f32.mrf.mxu1 }
 0xbe1   :  { %v944_v12 = vadd.f32 %v943_v9, %v920_v10  ;;  %v1093_v41 = vadd.f32 %v1092_v20, %v1072_v40 }
 0xbe3   :  { %v971_v4 = vadd.f32 %v968_v14, %v944_v12 }
 0xbe5   :  { %v974_v22 = vadd.f32 %v1328_v13, %v971_v4 }
 0xbe7   :  { %v975_v23 = vmax.f32 %v974_v22, 0.0 }
 0xbe9   :  { %1308 = vmatmul.msk.f32.vlgmr.msrb.gmra.mxu3 %vm192_vm1, %v975_v23 }
 0xbf1   :  { %1312 = vmatmul.msk.f32.vlgmr.msra.gmra.mxu3 %vm65_vm0, %v1635_v37  ;;  %v1174_v37 = vld [vmem:[#allocation2 + $0x238] sm:$0xff] }
 0xbf2   :  { %1181 = vmatpush.msra.mxu1 %v1174_v37 }
 0xbf4   :  { %1182 = vmatpush.msra.mxu1 %v1173_v1 }
 0xbf6   :  { %1183 = vmatpush.msra.mxu1 %v1172_v31 }
 0xbf8   :  { %1184 = vmatpush.msra.mxu1 %v1171_v2 }
 0xbfa   :  { %1185 = vmatpush.msra.mxu1 %v1170_v17 }
 0xbfc   :  { %1186 = vmatpush.msra.mxu1 %v1169_v16 }
 0xbfe   :  { %1187 = vmatpush.msra.mxu1 %v1168_v47 }
 0xc00   :  { %1188 = vmatpush.msra.mxu1 %v1167_v48 }
 0xc02   :  { %1189 = vmatpush.msra.mxu1 %v1166_v49 }
 0xc04   :  { %1190 = vmatpush.msra.mxu1 %v1165_v50 }
 0xc06   :  { %1191 = vmatpush.msra.mxu1 %v1164_v51 }
 0xc08   :  { %1192 = vmatpush.msra.mxu1 %v1163_v52 }
 0xc0a   :  { %1193 = vmatpush.msra.mxu1 %v1162_v53 }
 0xc0c   :  { %1194 = vmatpush.msra.mxu1 %v1161_v54 }
 0xc6c   :  { %v1002_v33 = vpop.f32.mrf.mxu3 }
 0xc6d   :  { %v1003_v35 = vadd.f32 %v1329_v18, %v1002_v33 }
 0xc6f   :  { %v1005_v39 = vmax.f32 %v1003_v35, 0.0 }
 0xc71   :  { %1309 = vmatmul.msk.f32.vlgmr.msrb.gmra.mxu0 %vm192_vm1, %v1005_v39 }
 0xc74   :  { %v1114_v43 = vpop.f32.mrf.mxu3 }
 0xc75   :  { %v1117_v44 = vadd.f32 %v1114_v43, %v1093_v41 }
 0xc77   :  { %v1120_v45 = vadd.f32 %v1330_v42, %v1117_v44 }
 0xc79   :  { %v1121_v46 = vmax.f32 %v1120_v45, 0.0 }
 0xc7b   :  { %1156 = vmatmul.f32.vlgmr.msra.gmra.mxu0 %v1121_v46 }
 0xcee   :  { %v1032_v56 = vpop.f32.mrf.mxu0 }
 0xcef   :  { %v1033_v57 = vadd.f32 %v1331_v55, %v1032_v56 }
 0xcf1   :  { %v1036_v58 = vsel %vm1035_vm2, %v1033_v57, -inf }
 0xcf2   :  { %1037 = vmax.xlane.f32.xlu0 %v1036_v58 }
 0xcf8   :  { %v1157_v60 = vpop.f32.mrf.mxu0 }
 0xcf9   :  { %v1158_v61 = vadd.f32 %v1332_v59, %v1157_v60 }
 0xcfb   :  { %v1160_v62 = vmax.f32 %v1158_v61, 0.0 }
 0xcfd   :  { %1195 = vmatmul.f32.vlgmr.msra.gmra.mxu1 %v1160_v62 }
 0xd65   :  { %v1038_v63 = vpop.xlane.xlu0 %1037 }
 0xd66   :  { %v1039_v3 = vsub.f32 %v1033_v57, %v1038_v63 }
 0xd68   :  { %v1040_v29 = vmul.f32 1.442695, %v1039_v3 }
 0xd6a   :  { %1334 = vpow2.f32 %v1040_v29 }
 0xd70   :  { %v1335_v38 = vpop.eup %1334 }
 0xd71   :  { %v1042_v5 = vsel %vm1035_vm2, %v1335_v38, 0.0 }
 0xd72   :  { %1043 = vadd.xlane.f32.xlu0 %v1042_v5 }
 0xd7a   :  { %v1196_v30 = vpop.f32.mrf.mxu1 }
 0xd7b   :  { %v1197_v9 = vadd.f32 %v1333_v7, %v1196_v30 }
 0xde5   :  { %v1044_v6 = vpop.xlane.xlu0 %1043 }
 0xde6   :  { %1336 = vrcp.f32 %v1044_v6 }
 0xdec   :  { %v1337_v8 = vpop.eup %1336 }
 0xded   :  { %v1046_v10 = vmul.f32 %v1337_v8, %v1335_v38 }
 0xdef   :  { %v1199_v11 = vmul.f32 %v1197_v9, %v1046_v10 }
 0xdf1   :  { %v1200_v12 = vsel %vm1035_vm2, %v1199_v11, 0.0 }
 0xdf2   :  { %1201 = vadd.xlane.f32.xlu1 %v1200_v12 }
 0xe65   :  { %v1202_v13 = vpop.xlane.xlu1 %1201 }
 0xe66   :  { %1203 = vst [vmem:[#allocation5] sm:$0x3] %v1202_v13 }
 0xe67   :  { %1214 = dma.vmem_to_hbm [thread:$0]  %s1210_s16, 32, %s1212_s1, [#allocation4]  }
 0xe68   :  { %1388 = dma.done.wait [#allocation4], 32  }
 0xe69   :  { %1389 = vsyncadd [#allocation4], 4294967264 }
 0xe6a   :  { %1219 = vsyncpa [#allocation3], 1 }
 0xe6b   :  { %1220 = vsyncpa [#allocation4], 1 }

</bundles_post_ra>
